<compile_context>
chip_gen: v7x
topology: tpu7x:2x2x1
jax: 0.10.0
libtpu: 0.0.40
codegen_flags: <defaults>
</compile_context>

<pallas_src>
import functools

import jax
import jax.numpy as jnp
from jax.experimental import pallas as pl
from jax.experimental.pallas import tpu as pltpu


def _round_up(x, m):
    return ((x + m - 1) // m) * m


def _layer_norm(x, w, b, eps=1e-5):
    # one-pass statistics: var = E[x^2] - mean^2 (halves cross-lane reduction chains)
    mu = jnp.mean(x, axis=-1, keepdims=True)
    ms = jnp.mean(x * x, axis=-1, keepdims=True)
    var = jnp.maximum(ms - mu * mu, 0.0)
    return (x - mu) * jax.lax.rsqrt(var + eps) * w + b


_SQRT_2_OVER_PI = 0.7978845608028654
_INV_SQRT_2 = 0.7071067811865476


def _gelu(x, exact):
    if exact:
        # Matches PyTorch nn.GELU() (exact erf form).
        return 0.5 * x * (1.0 + jax.lax.erf(x * _INV_SQRT_2))
    # tanh approximation: keeps the large (N, chunk) elementwise tensor on the EUP tanh
    # path instead of a VALU erf polynomial.  |delta| vs exact GELU < 1e-3.
    # TODO(synk): exact erf GELU (PyTorch default numerics) is behind exact_gelu=True.
    return 0.5 * x * (1.0 + jnp.tanh(_SQRT_2_OVER_PI * (x + 0.044715 * x * x * x)))


# ----------------------------------------------------------------------------------
# Kernel 1: the full transformer-block stack (all layers in one pallas_call)
# ----------------------------------------------------------------------------------
def transformer_stack_kernel(
        x_ref, ln1w_ref, ln1b_ref, wqkv_ref, wout_ref, bout_ref,
        ln2w_ref, ln2b_ref, w1_ref, b1_ref, w2_ref, b2_ref,
        clnw_ref, clnb_ref,
        out_ref,
        acc_ref, qkv_ref, ctx_ref,
        *, n_heads, bt, mlp_chunk, exact_gelu):
    layer = pl.program_id(1)
    n_layers = pl.num_programs(1)
    _, L, D = x_ref.shape
    N = bt * L
    hd = D // n_heads
    H4 = w1_ref.shape[-1]                      # 4 * D

    # resident f32 activation: initialize at the first layer of this batch tile
    @pl.when(layer == 0)
    def _():
        acc_ref[...] = x_ref[...].reshape(N, D).astype(jnp.float32)

    x = acc_ref[...]                                            # (N, D) f32

    # -------------------- self-attention branch --------------------
    wqkv = wqkv_ref[0]                                          # (D, 3D); q pre-scaled
    wdt = wqkv.dtype
    h = _layer_norm(x, ln1w_ref[0], ln1b_ref[0]).astype(wdt)
    # one wide MXU pass for the fused q/k/v projection, staged to VMEM scratch
    qkv_ref[...] = jnp.dot(h, wqkv, preferred_element_type=jnp.float32)   # (N, 3D)

    for i in range(n_heads):                    # static loop; ref-sliced loads/stores only
        qo, ko, vo = i * hd, D + i * hd, 2 * D + i * hd
        if bt == 1:
            qh = qkv_ref[:, qo:qo + hd]                         # (L, hd)
            kh = qkv_ref[:, ko:ko + hd]
            vh = qkv_ref[:, vo:vo + hd]
            s = jax.lax.dot_general(qh, kh, (((1,), (1,)), ((), ())),
                                    preferred_element_type=jnp.float32)   # (L, L)
        else:
            qh = qkv_ref[:, qo:qo + hd].reshape(bt, L, hd)
            kh = qkv_ref[:, ko:ko + hd].reshape(bt, L, hd)
            vh = qkv_ref[:, vo:vo + hd].reshape(bt, L, hd)
            s = jnp.einsum('bqd,bkd->bqk', qh, kh,
                           preferred_element_type=jnp.float32)            # (bt, L, L)
        s = s - jnp.max(s, axis=-1, keepdims=True)
        e = jnp.exp(s)
        p = e * pl.reciprocal(jnp.sum(e, axis=-1, keepdims=True), approx=True)
        if bt == 1:
            ov = jnp.dot(p, vh, preferred_element_type=jnp.float32)       # (L, hd)
        else:
            ov = jnp.einsum('bqk,bkd->bqd', p, vh,
                            preferred_element_type=jnp.float32)           # (bt, L, hd)
        ctx_ref[:, qo:qo + hd] = ov.reshape(N, hd)

    attn = jnp.dot(ctx_ref[...].astype(wdt), wout_ref[0],
                   preferred_element_type=jnp.float32) + bout_ref[0]
    x = x + attn

    # -------------------- MLP branch (hidden dim chunked) --------------------
    h2 = _layer_norm(x, ln2w_ref[0], ln2b_ref[0]).astype(wdt)
    for c in range(H4 // mlp_chunk):
        c0 = c * mlp_chunk
        m = jnp.dot(h2, w1_ref[0, :, c0:c0 + mlp_chunk],
                    preferred_element_type=jnp.float32) + b1_ref[0, :, c0:c0 + mlp_chunk]
        m = _gelu(m, exact_gelu)
        x = x + jnp.dot(m.astype(wdt), w2_ref[0, c0:c0 + mlp_chunk, :],
                        preferred_element_type=jnp.float32)
    x = x + b2_ref[0]

    acc_ref[...] = x

    # classifier LayerNorm fused at the last layer; the vocab projection runs in a
    # separate pallas_call so (D, Vp) weights / (bt, L, Vp) logits never sit in VMEM
    # across the layer sweep.
    @pl.when(layer == n_layers - 1)
    def _():
        hc = _layer_norm(x, clnw_ref[...], clnb_ref[...])
        out_ref[...] = hc.reshape(bt, L, D).astype(out_ref.dtype)


def fused_transformer_stack(x_emb, p, *, n_heads, batch_tile=1, mlp_chunk=None,
                            exact_gelu=False, weight_buffers=None,
                            vmem_limit_bytes=None):
    B, L, D = x_emb.shape
    n_layers = p['wqkv'].shape[0]
    H4 = p['w1'].shape[-1]
    bt = batch_tile
    assert B % bt == 0, "batch_tile must divide batch"
    assert D % n_heads == 0, "embed_dim must be divisible by n_heads"

    if mlp_chunk is None:
        mlp_chunk = 512 if (H4 > 512 and H4 % 512 == 0) else H4
    assert H4 % mlp_chunk == 0

    if vmem_limit_bytes is None:
        wb = jnp.dtype(p['wqkv'].dtype).itemsize
        per_layer_w = (3 * D * D + D * D + 2 * D * H4) * wb + (6 * D + H4) * 4
        act_in = 2 * bt * L * D * jnp.dtype(x_emb.dtype).itemsize   # double-buffered x
        act_out = 2 * bt * L * D * jnp.dtype(x_emb.dtype).itemsize  # double-buffered out
        scratch = (bt * L * D + bt * L * 3 * D + bt * L * D) * 4
        est = 2 * per_layer_w + act_in + act_out + scratch
        vmem_limit_bytes = min(max(int(1.25 * est) + (4 << 20), 32 << 20), 100 << 20)

    kernel = functools.partial(transformer_stack_kernel, n_heads=n_heads, bt=bt,
                               mlp_chunk=mlp_chunk, exact_gelu=exact_gelu)

    xmap = lambda b, l: (b, 0, 0)              # resident across the layer axis
    lmap = lambda b, l: (l, 0, 0)              # streamed per layer
    cmap = lambda b, l: (0, 0)                 # layer-constant (classifier LN)

    def wspec(shape):
        # large per-layer weights: optionally deepen prefetch (useful on v5e only)
        if weight_buffers is None:
            return pl.BlockSpec(shape, lmap)
        return pl.BlockSpec(shape, lmap, pipeline_mode=pl.Buffered(weight_buffers))

    return pl.pallas_call(
        kernel,
        out_shape=jax.ShapeDtypeStruct((B, L, D), x_emb.dtype),
        grid=(B // bt, n_layers),
        in_specs=[
            pl.BlockSpec((bt, L, D), xmap),          # token + positional embeddings
            pl.BlockSpec((1, 1, D), lmap),           # ln1 weight
            pl.BlockSpec((1, 1, D), lmap),           # ln1 bias
            wspec((1, D, 3 * D)),                    # fused qkv weight (q pre-scaled)
            pl.BlockSpec((1, D, D), lmap),           # attn out weight
            pl.BlockSpec((1, 1, D), lmap),           # attn out bias
            pl.BlockSpec((1, 1, D), lmap),           # ln2 weight
            pl.BlockSpec((1, 1, D), lmap),           # ln2 bias
            wspec((1, D, H4)),                       # mlp fc1 weight
            pl.BlockSpec((1, 1, H4), lmap),          # mlp fc1 bias
            wspec((1, H4, D)),                       # mlp fc2 weight
            pl.BlockSpec((1, 1, D), lmap),           # mlp fc2 bias
            pl.BlockSpec((1, D), cmap),              # classifier LN weight
            pl.BlockSpec((1, D), cmap),              # classifier LN bias
        ],
        out_specs=pl.BlockSpec((bt, L, D), xmap),    # normalized final hidden states
        scratch_shapes=[
            pltpu.VMEM((bt * L, D), jnp.float32),        # carried activation
            pltpu.VMEM((bt * L, 3 * D), jnp.float32),    # fused qkv staging
            pltpu.VMEM((bt * L, D), jnp.float32),        # per-head context assembly
        ],
        compiler_params=pltpu.CompilerParams(
            dimension_semantics=("parallel", "arbitrary"),
            vmem_limit_bytes=int(vmem_limit_bytes)),
    )(x_emb, p['ln1_w'], p['ln1_b'], p['wqkv'], p['wout'], p['bout'],
      p['ln2_w'], p['ln2_b'], p['w1'], p['b1'], p['w2'], p['b2'],
      p['cls_ln_w'], p['cls_ln_b'])


# ----------------------------------------------------------------------------------
# Kernel 2: classifier head (LayerNorm already applied in kernel 1)
# ----------------------------------------------------------------------------------
def classifier_kernel(h_ref, w_ref, b_ref, out_ref):
    btc, L, D = h_ref.shape
    w = w_ref[...]
    h = h_ref[...].reshape(btc * L, D).astype(w.dtype)
    logits = jnp.dot(h, w, preferred_element_type=jnp.float32) + b_ref[...]
    out_ref[...] = logits.reshape(btc, L, -1).astype(out_ref.dtype)


def classifier_head(h, p, *, batch_tile=1, vocab_tile=None, vmem_limit_bytes=None):
    B, L, D = h.shape
    Vp = p['cls_w'].shape[1]
    bt = batch_tile
    assert B % bt == 0
    if vocab_tile is None:
        vocab_tile = 1024 if (Vp > 2048 and Vp % 1024 == 0) else Vp
    assert Vp % vocab_tile == 0

    cp = dict(dimension_semantics=("parallel", "parallel"))
    if vmem_limit_bytes is not None:
        cp["vmem_limit_bytes"] = int(vmem_limit_bytes)

    return pl.pallas_call(
        classifier_kernel,
        out_shape=jax.ShapeDtypeStruct((B, L, Vp), h.dtype),
        grid=(B // bt, Vp // vocab_tile),
        in_specs=[
            pl.BlockSpec((bt, L, D), lambda i, j: (i, 0, 0)),
            pl.BlockSpec((D, vocab_tile), lambda i, j: (0, j)),
            pl.BlockSpec((1, vocab_tile), lambda i, j: (0, j)),
        ],
        out_specs=pl.BlockSpec((bt, L, vocab_tile), lambda i, j: (i, 0, j)),
        compiler_params=pltpu.CompilerParams(**cp),
    )(h, p['cls_w'], p['cls_b'])


# ----------------------------------------------------------------------------------
# Full forward (y=None path of MaskTransformer.forward)
# ----------------------------------------------------------------------------------
def mask_transformer_forward(idx, params, n_heads, vocab_size, *, batch_tile=1,
                             mlp_chunk=None, exact_gelu=False, weight_buffers=None,
                             vmem_limit_bytes=None):
    """idx (B, L) int32 -> logits (B, L, vocab_size).  Eval mode, y=None path."""
    B, L = idx.shape
    # XLA glue: embedding gather + positional embedding (drop_emb = identity in eval)
    x = jnp.take(params['token_emb'], idx, axis=0) + params['pos_emb'][:, :L, :]
    h = fused_transformer_stack(x, params, n_heads=n_heads, batch_tile=batch_tile,
                                mlp_chunk=mlp_chunk, exact_gelu=exact_gelu,
                                weight_buffers=weight_buffers,
                                vmem_limit_bytes=vmem_limit_bytes)
    logits = classifier_head(h, params, batch_tile=batch_tile)
    return logits[:, :, :vocab_size]          # drop lane-padding vocab columns


def init_params(key, vocab_size, embed_dim, n_heads, n_layers, n_tokens,
                weight_dtype=jnp.bfloat16):
    """bf16 weights by default (f32 accumulation in-kernel); pass jnp.float32 for
    reference-parity runs.  The 1/sqrt(head_dim) attention scale is baked into the
    q columns of the fused qkv weight (free on the host)."""
    D = embed_dim
    hd = D // n_heads
    Vp = _round_up(vocab_size, 128)

    def tn(k, shape, std=0.02):
        return jax.random.truncated_normal(k, -2.0, 2.0, shape, jnp.float32) * std

    keys = jax.random.split(key, 3 + n_layers)

    wqkv, wout, w1, w2 = [], [], [], []
    for i in range(n_layers):
        bk = jax.random.split(keys[3 + i], 6)
        wq = tn(bk[0], (D, D)) * (1.0 / (hd ** 0.5))
        wk = tn(bk[1], (D, D))
        wv = tn(bk[2], (D, D))
        wqkv.append(jnp.concatenate([wq, wk, wv], axis=-1))     # fused (D, 3D)
        wout.append(tn(bk[3], (D, D)))
        w1.append(tn(bk[4], (D, 4 * D)))
        w2.append(tn(bk[5], (4 * D, D)))

    cls_w = jnp.zeros((D, Vp), jnp.float32).at[:, :vocab_size].set(
        tn(keys[2], (D, vocab_size)))

    return {
        'token_emb': tn(keys[0], (vocab_size + 1, D)),          # +1 for the mask token
        'pos_emb': tn(keys[1], (1, n_tokens, D)),
        'ln1_w': jnp.ones((n_layers, 1, D), jnp.float32),
        'ln1_b': jnp.zeros((n_layers, 1, D), jnp.float32),
        'wqkv': jnp.stack(wqkv).astype(weight_dtype),           # (n_layers, D, 3D)
        'wout': jnp.stack(wout).astype(weight_dtype),           # (n_layers, D, D)
        'bout': jnp.zeros((n_layers, 1, D), jnp.float32),
        'ln2_w': jnp.ones((n_layers, 1, D), jnp.float32),
        'ln2_b': jnp.zeros((n_layers, 1, D), jnp.float32),
        'w1': jnp.stack(w1).astype(weight_dtype),               # (n_layers, D, 4D)
        'b1': jnp.zeros((n_layers, 1, 4 * D), jnp.float32),
        'w2': jnp.stack(w2).astype(weight_dtype),               # (n_layers, 4D, D)
        'b2': jnp.zeros((n_layers, 1, D), jnp.float32),
        'cls_ln_w': jnp.ones((1, D), jnp.float32),
        'cls_ln_b': jnp.zeros((1, D), jnp.float32),
        'cls_w': cls_w.astype(weight_dtype),                    # (D, Vp) lane-padded vocab
        'cls_b': jnp.zeros((1, Vp), jnp.float32),
    }


if __name__ == "__main__":
    vocab_size = 16
    embed_dim = 32       # D
    n_heads = 4          # head_dim = 8
    n_layers = 2
    n_tokens = 8         # L
    B = 2

    key = jax.random.PRNGKey(0)
    pkey, ikey = jax.random.split(key)
    params = init_params(pkey, vocab_size, embed_dim, n_heads, n_layers, n_tokens)

    # token ids in [0, vocab_size]  (mask_token_id == vocab_size is a valid input id)
    idx = jax.random.randint(ikey, (B, n_tokens), 0, vocab_size + 1, dtype=jnp.int32)

    fwd = jax.jit(functools.partial(mask_transformer_forward, n_heads=n_heads,
                                    vocab_size=vocab_size, batch_tile=1))
    logits = jax.block_until_ready(fwd(idx, params))

    assert logits.shape == (B, n_tokens, vocab_size)
    assert bool(jnp.all(jnp.isfinite(logits)))
    print("KERNEL_OK")
</pallas_src>

<mosaic_0001>
module attributes {stable_mosaic.version = 11 : i64} {
  func.func @classifier_kernel(%arg0: i32, %arg1: i32, %arg2: memref<1x8x32xf32, #tpu.memory_space<vmem>>, %arg3: memref<32x128xbf16, #tpu.memory_space<vmem>>, %arg4: memref<1x128xf32, #tpu.memory_space<vmem>>, %arg5: memref<1x8x128xf32, #tpu.memory_space<vmem>>) attributes {dimension_semantics = [#tpu.dimension_semantics<parallel>, #tpu.dimension_semantics<parallel>], iteration_bounds = array<i64: 2, 1>, scalar_prefetch = 0 : i64, scratch_operands = 0 : i64, tpu.core_type = #tpu.core_type<tc>, window_params = [{transform_indices = @transform_0, window_bounds = array<i64: 1, 8, 32>}, {transform_indices = @transform_1, window_bounds = array<i64: 32, 128>}, {transform_indices = @transform_2, window_bounds = array<i64: 1, 128>}, {transform_indices = @transform_3, window_bounds = array<i64: 1, 8, 128>}]} {
    %c0 = arith.constant 0 : index
    %c0_0 = arith.constant 0 : index
    %0 = vector.load %arg3[%c0, %c0_0] : memref<32x128xbf16, #tpu.memory_space<vmem>>, vector<32x128xbf16>
    %c0_1 = arith.constant 0 : index
    %c0_2 = arith.constant 0 : index
    %c0_3 = arith.constant 0 : index
    %1 = vector.load %arg2[%c0_1, %c0_2, %c0_3] : memref<1x8x32xf32, #tpu.memory_space<vmem>>, vector<1x8x32xf32>
    %2 = vector.shape_cast %1 : vector<1x8x32xf32> to vector<8x32xf32>
    %3 = arith.truncf %2 : vector<8x32xf32> to vector<8x32xbf16>
    %cst = arith.constant dense<0.000000e+00> : vector<8x128xf32>
    %4 = tpu.matmul %3, %0, %cst {dimension_numbers = #tpu.dot_dimension_numbers<[1], [0], [0], [1], [0, 0, 1, 1], [], []>} : vector<8x32xbf16>, vector<32x128xbf16>, vector<8x128xf32> -> vector<8x128xf32>
    %c0_4 = arith.constant 0 : index
    %c0_5 = arith.constant 0 : index
    %5 = vector.load %arg4[%c0_4, %c0_5] : memref<1x128xf32, #tpu.memory_space<vmem>>, vector<1x128xf32>
    %6 = vector.broadcast %5 : vector<1x128xf32> to vector<8x128xf32>
    %7 = arith.addf %4, %6 : vector<8x128xf32>
    %8 = vector.shape_cast %7 : vector<8x128xf32> to vector<1x8x128xf32>
    %c0_6 = arith.constant 0 : index
    %c0_7 = arith.constant 0 : index
    %c0_8 = arith.constant 0 : index
    %9 = vector.load %arg5[%c0_6, %c0_7, %c0_8] : memref<1x8x128xf32, #tpu.memory_space<vmem>>, vector<1x8x128xf32>
    tpu.vector_store %arg5[%c0_6, %c0_7, %c0_8], %8 {strides = array<i32>} : memref<1x8x128xf32, #tpu.memory_space<vmem>>, vector<1x8x128xf32>,
    return
  }
  func.func @transform_0(%arg0: i32, %arg1: i32) -> (i32, i32, i32) {
    %c0_i32 = arith.constant 0 : i32
    %c0_i32_0 = arith.constant 0 : i32
    %c0_i32_1 = arith.constant 0 : i32
    return %arg0, %c0_i32, %c0_i32_0 : i32, i32, i32
  }
  func.func @transform_1(%arg0: i32, %arg1: i32) -> (i32, i32) {
    %c0_i32 = arith.constant 0 : i32
    %c0_i32_0 = arith.constant 0 : i32
    return %c0_i32, %arg1 : i32, i32
  }
  func.func @transform_2(%arg0: i32, %arg1: i32) -> (i32, i32) {
    %c0_i32 = arith.constant 0 : i32
    %c0_i32_0 = arith.constant 0 : i32
    return %c0_i32, %arg1 : i32, i32
  }
  func.func @transform_3(%arg0: i32, %arg1: i32) -> (i32, i32, i32) {
    %c0_i32 = arith.constant 0 : i32
    %c0_i32_0 = arith.constant 0 : i32
    return %arg0, %c0_i32, %arg1 : i32, i32, i32
  }
}

module attributes {stable_mosaic.version = 11 : i64} {
  func.func @transformer_stack_kernel(%arg0: i32, %arg1: i32, %arg2: memref<1x8x32xf32, #tpu.memory_space<vmem>>, %arg3: memref<1x1x32xf32, #tpu.memory_space<vmem>>, %arg4: memref<1x1x32xf32, #tpu.memory_space<vmem>>, %arg5: memref<1x32x96xbf16, #tpu.memory_space<vmem>>, %arg6: memref<1x32x32xbf16, #tpu.memory_space<vmem>>, %arg7: memref<1x1x32xf32, #tpu.memory_space<vmem>>, %arg8: memref<1x1x32xf32, #tpu.memory_space<vmem>>, %arg9: memref<1x1x32xf32, #tpu.memory_space<vmem>>, %arg10: memref<1x32x128xbf16, #tpu.memory_space<vmem>>, %arg11: memref<1x1x128xf32, #tpu.memory_space<vmem>>, %arg12: memref<1x128x32xbf16, #tpu.memory_space<vmem>>, %arg13: memref<1x1x32xf32, #tpu.memory_space<vmem>>, %arg14: memref<1x32xf32, #tpu.memory_space<vmem>>, %arg15: memref<1x32xf32, #tpu.memory_space<vmem>>, %arg16: memref<1x8x32xf32, #tpu.memory_space<vmem>>, %arg17: memref<8x32xf32, #tpu.memory_space<vmem>>, %arg18: memref<8x96xf32, #tpu.memory_space<vmem>>, %arg19: memref<8x32xf32, #tpu.memory_space<vmem>>) attributes {dimension_semantics = [#tpu.dimension_semantics<parallel>, #tpu.dimension_semantics<arbitrary>], iteration_bounds = array<i64: 2, 2>, scalar_prefetch = 0 : i64, scratch_operands = 3 : i64, tpu.core_type = #tpu.core_type<tc>, window_params = [{transform_indices = @transform_0, window_bounds = array<i64: 1, 8, 32>}, {transform_indices = @transform_1, window_bounds = array<i64: 1, 1, 32>}, {transform_indices = @transform_2, window_bounds = array<i64: 1, 1, 32>}, {transform_indices = @transform_3, window_bounds = array<i64: 1, 32, 96>}, {transform_indices = @transform_4, window_bounds = array<i64: 1, 32, 32>}, {transform_indices = @transform_5, window_bounds = array<i64: 1, 1, 32>}, {transform_indices = @transform_6, window_bounds = array<i64: 1, 1, 32>}, {transform_indices = @transform_7, window_bounds = array<i64: 1, 1, 32>}, {transform_indices = @transform_8, window_bounds = array<i64: 1, 32, 128>}, {transform_indices = @transform_9, window_bounds = array<i64: 1, 1, 128>}, {transform_indices = @transform_10, window_bounds = array<i64: 1, 128, 32>}, {transform_indices = @transform_11, window_bounds = array<i64: 1, 1, 32>}, {pipeline_mode = #tpu.pipeline_mode<synchronous>, transform_indices = @transform_12, window_bounds = array<i64: 1, 32>}, {pipeline_mode = #tpu.pipeline_mode<synchronous>, transform_indices = @transform_13, window_bounds = array<i64: 1, 32>}, {transform_indices = @transform_14, window_bounds = array<i64: 1, 8, 32>}]} {
    %c0_i32 = arith.constant 0 : i32
    %0 = arith.cmpi eq, %arg1, %c0_i32 : i32
    %1 = arith.extui %0 : i1 to i32
    %c0_i32_0 = arith.constant 0 : i32
    %2 = arith.cmpi ne, %1, %c0_i32_0 : i32
    scf.if %2 {
      %c0_98 = arith.constant 0 : index
      %c0_99 = arith.constant 0 : index
      %c0_100 = arith.constant 0 : index
      %173 = vector.load %arg2[%c0_98, %c0_99, %c0_100] : memref<1x8x32xf32, #tpu.memory_space<vmem>>, vector<1x8x32xf32>
      %174 = vector.shape_cast %173 : vector<1x8x32xf32> to vector<8x32xf32>
      %c0_101 = arith.constant 0 : index
      %c0_102 = arith.constant 0 : index
      %175 = vector.load %arg17[%c0_101, %c0_102] : memref<8x32xf32, #tpu.memory_space<vmem>>, vector<8x32xf32>
      tpu.vector_store %arg17[%c0_101, %c0_102], %174 {strides = array<i32>} : memref<8x32xf32, #tpu.memory_space<vmem>>, vector<8x32xf32>,
    } else {
    }
    %c0 = arith.constant 0 : index
    %c0_1 = arith.constant 0 : index
    %3 = vector.load %arg17[%c0, %c0_1] : memref<8x32xf32, #tpu.memory_space<vmem>>, vector<8x32xf32>
    %c0_2 = arith.constant 0 : index
    %c0_3 = arith.constant 0 : index
    %c0_4 = arith.constant 0 : index
    %4 = vector.load %arg5[%c0_2, %c0_3, %c0_4] : memref<1x32x96xbf16, #tpu.memory_space<vmem>>, vector<1x32x96xbf16>
    %5 = vector.shape_cast %4 : vector<1x32x96xbf16> to vector<32x96xbf16>
    %c0_5 = arith.constant 0 : index
    %c0_6 = arith.constant 0 : index
    %c0_7 = arith.constant 0 : index
    %6 = vector.load %arg3[%c0_5, %c0_6, %c0_7] : memref<1x1x32xf32, #tpu.memory_space<vmem>>, vector<1x1x32xf32>
    %7 = vector.shape_cast %6 : vector<1x1x32xf32> to vector<1x32xf32>
    %c0_8 = arith.constant 0 : index
    %c0_9 = arith.constant 0 : index
    %c0_10 = arith.constant 0 : index
    %8 = vector.load %arg4[%c0_8, %c0_9, %c0_10] : memref<1x1x32xf32, #tpu.memory_space<vmem>>, vector<1x1x32xf32>
    %9 = vector.shape_cast %8 : vector<1x1x32xf32> to vector<1x32xf32>
    %cst = arith.constant dense<0.000000e+00> : vector<8xf32>
    %10 = vector.multi_reduction <add>, %3, %cst [1] : vector<8x32xf32> to vector<8xf32>
    %11 = vector.shape_cast %10 : vector<8xf32> to vector<8x1xf32>
    %cst_11 = arith.constant 3.200000e+01 : f32
    %12 = vector.broadcast %cst_11 : f32 to vector<8x1xf32>
    %13 = arith.divf %11, %12 : vector<8x1xf32>
    %14 = arith.mulf %3, %3 : vector<8x32xf32>
    %cst_12 = arith.constant dense<0.000000e+00> : vector<8xf32>
    %15 = vector.multi_reduction <add>, %14, %cst_12 [1] : vector<8x32xf32> to vector<8xf32>
    %16 = vector.shape_cast %15 : vector<8xf32> to vector<8x1xf32>
    %cst_13 = arith.constant 3.200000e+01 : f32
    %17 = vector.broadcast %cst_13 : f32 to vector<8x1xf32>
    %18 = arith.divf %16, %17 : vector<8x1xf32>
    %19 = arith.mulf %13, %13 : vector<8x1xf32>
    %20 = arith.subf %18, %19 : vector<8x1xf32>
    %cst_14 = arith.constant 0.000000e+00 : f32
    %21 = vector.broadcast %cst_14 : f32 to vector<8x1xf32>
    %22 = arith.maximumf %20, %21 : vector<8x1xf32>
    %23 = vector.broadcast %13 : vector<8x1xf32> to vector<8x32xf32>
    %24 = arith.subf %3, %23 : vector<8x32xf32>
    %cst_15 = arith.constant 9.99999974E-6 : f32
    %25 = vector.broadcast %cst_15 : f32 to vector<8x1xf32>
    %26 = arith.addf %22, %25 : vector<8x1xf32>
    %27 = math.rsqrt %26 : vector<8x1xf32>
    %28 = vector.broadcast %27 : vector<8x1xf32> to vector<8x32xf32>
    %29 = arith.mulf %24, %28 : vector<8x32xf32>
    %30 = vector.broadcast %7 : vector<1x32xf32> to vector<8x32xf32>
    %31 = arith.mulf %29, %30 : vector<8x32xf32>
    %32 = vector.broadcast %9 : vector<1x32xf32> to vector<8x32xf32>
    %33 = arith.addf %31, %32 : vector<8x32xf32>
    %34 = arith.truncf %33 : vector<8x32xf32> to vector<8x32xbf16>
    %cst_16 = arith.constant dense<0.000000e+00> : vector<8x96xf32>
    %35 = tpu.matmul %34, %5, %cst_16 {dimension_numbers = #tpu.dot_dimension_numbers<[1], [0], [0], [1], [0, 0, 1, 1], [], []>} : vector<8x32xbf16>, vector<32x96xbf16>, vector<8x96xf32> -> vector<8x96xf32>
    %c0_17 = arith.constant 0 : index
    %c0_18 = arith.constant 0 : index
    %36 = vector.load %arg18[%c0_17, %c0_18] : memref<8x96xf32, #tpu.memory_space<vmem>>, vector<8x96xf32>
    tpu.vector_store %arg18[%c0_17, %c0_18], %35 {strides = array<i32>} : memref<8x96xf32, #tpu.memory_space<vmem>>, vector<8x96xf32>,
    %c0_19 = arith.constant 0 : index
    %c0_20 = arith.constant 0 : index
    %37 = vector.load %arg18[%c0_19, %c0_20] : memref<8x96xf32, #tpu.memory_space<vmem>>, vector<8x8xf32>
    %c0_21 = arith.constant 0 : index
    %c32 = arith.constant 32 : index
    %38 = vector.load %arg18[%c0_21, %c32] : memref<8x96xf32, #tpu.memory_space<vmem>>, vector<8x8xf32>
    %c0_22 = arith.constant 0 : index
    %c64 = arith.constant 64 : index
    %39 = vector.load %arg18[%c0_22, %c64] : memref<8x96xf32, #tpu.memory_space<vmem>>, vector<8x8xf32>
    %cst_23 = arith.constant dense<0.000000e+00> : vector<8x8xf32>
    %40 = tpu.matmul %37, %38, %cst_23 {dimension_numbers = #tpu.dot_dimension_numbers<[1], [1], [0], [0], [0, 0, 1, 0], [], []>} : vector<8x8xf32>, vector<8x8xf32>, vector<8x8xf32> -> vector<8x8xf32>
    %cst_24 = arith.constant dense<0xFF800000> : vector<8xf32>
    %41 = vector.multi_reduction <maximumf>, %40, %cst_24 [1] : vector<8x8xf32> to vector<8xf32>
    %42 = vector.shape_cast %41 : vector<8xf32> to vector<8x1xf32>
    %43 = vector.broadcast %42 : vector<8x1xf32> to vector<8x8xf32>
    %44 = arith.subf %40, %43 : vector<8x8xf32>
    %45 = math.exp %44 : vector<8x8xf32>
    %cst_25 = arith.constant dense<0.000000e+00> : vector<8xf32>
    %46 = vector.multi_reduction <add>, %45, %cst_25 [1] : vector<8x8xf32> to vector<8xf32>
    %47 = vector.shape_cast %46 : vector<8xf32> to vector<8x1xf32>
    %48 = tpu.reciprocal %47 {approx = true} : vector<8x1xf32> -> vector<8x1xf32>
    %49 = vector.broadcast %48 : vector<8x1xf32> to vector<8x8xf32>
    %50 = arith.mulf %45, %49 : vector<8x8xf32>
    %cst_26 = arith.constant dense<0.000000e+00> : vector<8x8xf32>
    %51 = tpu.matmul %50, %39, %cst_26 {dimension_numbers = #tpu.dot_dimension_numbers<[1], [0], [0], [1], [0, 0, 1, 1], [], []>} : vector<8x8xf32>, vector<8x8xf32>, vector<8x8xf32> -> vector<8x8xf32>
    %c0_27 = arith.constant 0 : index
    %c0_28 = arith.constant 0 : index
    %52 = vector.load %arg19[%c0_27, %c0_28] : memref<8x32xf32, #tpu.memory_space<vmem>>, vector<8x8xf32>
    tpu.vector_store %arg19[%c0_27, %c0_28], %51 {strides = array<i32>} : memref<8x32xf32, #tpu.memory_space<vmem>>, vector<8x8xf32>,
    %c0_29 = arith.constant 0 : index
    %c8 = arith.constant 8 : index
    %53 = vector.load %arg18[%c0_29, %c8] : memref<8x96xf32, #tpu.memory_space<vmem>>, vector<8x8xf32>
    %c0_30 = arith.constant 0 : index
    %c40 = arith.constant 40 : index
    %54 = vector.load %arg18[%c0_30, %c40] : memref<8x96xf32, #tpu.memory_space<vmem>>, vector<8x8xf32>
    %c0_31 = arith.constant 0 : index
    %c72 = arith.constant 72 : index
    %55 = vector.load %arg18[%c0_31, %c72] : memref<8x96xf32, #tpu.memory_space<vmem>>, vector<8x8xf32>
    %cst_32 = arith.constant dense<0.000000e+00> : vector<8x8xf32>
    %56 = tpu.matmul %53, %54, %cst_32 {dimension_numbers = #tpu.dot_dimension_numbers<[1], [1], [0], [0], [0, 0, 1, 0], [], []>} : vector<8x8xf32>, vector<8x8xf32>, vector<8x8xf32> -> vector<8x8xf32>
    %cst_33 = arith.constant dense<0xFF800000> : vector<8xf32>
    %57 = vector.multi_reduction <maximumf>, %56, %cst_33 [1] : vector<8x8xf32> to vector<8xf32>
    %58 = vector.shape_cast %57 : vector<8xf32> to vector<8x1xf32>
    %59 = vector.broadcast %58 : vector<8x1xf32> to vector<8x8xf32>
    %60 = arith.subf %56, %59 : vector<8x8xf32>
    %61 = math.exp %60 : vector<8x8xf32>
    %cst_34 = arith.constant dense<0.000000e+00> : vector<8xf32>
    %62 = vector.multi_reduction <add>, %61, %cst_34 [1] : vector<8x8xf32> to vector<8xf32>
    %63 = vector.shape_cast %62 : vector<8xf32> to vector<8x1xf32>
    %64 = tpu.reciprocal %63 {approx = true} : vector<8x1xf32> -> vector<8x1xf32>
    %65 = vector.broadcast %64 : vector<8x1xf32> to vector<8x8xf32>
    %66 = arith.mulf %61, %65 : vector<8x8xf32>
    %cst_35 = arith.constant dense<0.000000e+00> : vector<8x8xf32>
    %67 = tpu.matmul %66, %55, %cst_35 {dimension_numbers = #tpu.dot_dimension_numbers<[1], [0], [0], [1], [0, 0, 1, 1], [], []>} : vector<8x8xf32>, vector<8x8xf32>, vector<8x8xf32> -> vector<8x8xf32>
    %c0_36 = arith.constant 0 : index
    %c8_37 = arith.constant 8 : index
    %68 = vector.load %arg19[%c0_36, %c8_37] : memref<8x32xf32, #tpu.memory_space<vmem>>, vector<8x8xf32>
    tpu.vector_store %arg19[%c0_36, %c8_37], %67 {strides = array<i32>} : memref<8x32xf32, #tpu.memory_space<vmem>>, vector<8x8xf32>,
    %c0_38 = arith.constant 0 : index
    %c16 = arith.constant 16 : index
    %69 = vector.load %arg18[%c0_38, %c16] : memref<8x96xf32, #tpu.memory_space<vmem>>, vector<8x8xf32>
    %c0_39 = arith.constant 0 : index
    %c48 = arith.constant 48 : index
    %70 = vector.load %arg18[%c0_39, %c48] : memref<8x96xf32, #tpu.memory_space<vmem>>, vector<8x8xf32>
    %c0_40 = arith.constant 0 : index
    %c80 = arith.constant 80 : index
    %71 = vector.load %arg18[%c0_40, %c80] : memref<8x96xf32, #tpu.memory_space<vmem>>, vector<8x8xf32>
    %cst_41 = arith.constant dense<0.000000e+00> : vector<8x8xf32>
    %72 = tpu.matmul %69, %70, %cst_41 {dimension_numbers = #tpu.dot_dimension_numbers<[1], [1], [0], [0], [0, 0, 1, 0], [], []>} : vector<8x8xf32>, vector<8x8xf32>, vector<8x8xf32> -> vector<8x8xf32>
    %cst_42 = arith.constant dense<0xFF800000> : vector<8xf32>
    %73 = vector.multi_reduction <maximumf>, %72, %cst_42 [1] : vector<8x8xf32> to vector<8xf32>
    %74 = vector.shape_cast %73 : vector<8xf32> to vector<8x1xf32>
    %75 = vector.broadcast %74 : vector<8x1xf32> to vector<8x8xf32>
    %76 = arith.subf %72, %75 : vector<8x8xf32>
    %77 = math.exp %76 : vector<8x8xf32>
    %cst_43 = arith.constant dense<0.000000e+00> : vector<8xf32>
    %78 = vector.multi_reduction <add>, %77, %cst_43 [1] : vector<8x8xf32> to vector<8xf32>
    %79 = vector.shape_cast %78 : vector<8xf32> to vector<8x1xf32>
    %80 = tpu.reciprocal %79 {approx = true} : vector<8x1xf32> -> vector<8x1xf32>
    %81 = vector.broadcast %80 : vector<8x1xf32> to vector<8x8xf32>
    %82 = arith.mulf %77, %81 : vector<8x8xf32>
    %cst_44 = arith.constant dense<0.000000e+00> : vector<8x8xf32>
    %83 = tpu.matmul %82, %71, %cst_44 {dimension_numbers = #tpu.dot_dimension_numbers<[1], [0], [0], [1], [0, 0, 1, 1], [], []>} : vector<8x8xf32>, vector<8x8xf32>, vector<8x8xf32> -> vector<8x8xf32>
    %c0_45 = arith.constant 0 : index
    %c16_46 = arith.constant 16 : index
    %84 = vector.load %arg19[%c0_45, %c16_46] : memref<8x32xf32, #tpu.memory_space<vmem>>, vector<8x8xf32>
    tpu.vector_store %arg19[%c0_45, %c16_46], %83 {strides = array<i32>} : memref<8x32xf32, #tpu.memory_space<vmem>>, vector<8x8xf32>,
    %c0_47 = arith.constant 0 : index
    %c24 = arith.constant 24 : index
    %85 = vector.load %arg18[%c0_47, %c24] : memref<8x96xf32, #tpu.memory_space<vmem>>, vector<8x8xf32>
    %c0_48 = arith.constant 0 : index
    %c56 = arith.constant 56 : index
    %86 = vector.load %arg18[%c0_48, %c56] : memref<8x96xf32, #tpu.memory_space<vmem>>, vector<8x8xf32>
    %c0_49 = arith.constant 0 : index
    %c88 = arith.constant 88 : index
    %87 = vector.load %arg18[%c0_49, %c88] : memref<8x96xf32, #tpu.memory_space<vmem>>, vector<8x8xf32>
    %cst_50 = arith.constant dense<0.000000e+00> : vector<8x8xf32>
    %88 = tpu.matmul %85, %86, %cst_50 {dimension_numbers = #tpu.dot_dimension_numbers<[1], [1], [0], [0], [0, 0, 1, 0], [], []>} : vector<8x8xf32>, vector<8x8xf32>, vector<8x8xf32> -> vector<8x8xf32>
    %cst_51 = arith.constant dense<0xFF800000> : vector<8xf32>
    %89 = vector.multi_reduction <maximumf>, %88, %cst_51 [1] : vector<8x8xf32> to vector<8xf32>
    %90 = vector.shape_cast %89 : vector<8xf32> to vector<8x1xf32>
    %91 = vector.broadcast %90 : vector<8x1xf32> to vector<8x8xf32>
    %92 = arith.subf %88, %91 : vector<8x8xf32>
    %93 = math.exp %92 : vector<8x8xf32>
    %cst_52 = arith.constant dense<0.000000e+00> : vector<8xf32>
    %94 = vector.multi_reduction <add>, %93, %cst_52 [1] : vector<8x8xf32> to vector<8xf32>
    %95 = vector.shape_cast %94 : vector<8xf32> to vector<8x1xf32>
    %96 = tpu.reciprocal %95 {approx = true} : vector<8x1xf32> -> vector<8x1xf32>
    %97 = vector.broadcast %96 : vector<8x1xf32> to vector<8x8xf32>
    %98 = arith.mulf %93, %97 : vector<8x8xf32>
    %cst_53 = arith.constant dense<0.000000e+00> : vector<8x8xf32>
    %99 = tpu.matmul %98, %87, %cst_53 {dimension_numbers = #tpu.dot_dimension_numbers<[1], [0], [0], [1], [0, 0, 1, 1], [], []>} : vector<8x8xf32>, vector<8x8xf32>, vector<8x8xf32> -> vector<8x8xf32>
    %c0_54 = arith.constant 0 : index
    %c24_55 = arith.constant 24 : index
    %100 = vector.load %arg19[%c0_54, %c24_55] : memref<8x32xf32, #tpu.memory_space<vmem>>, vector<8x8xf32>
    tpu.vector_store %arg19[%c0_54, %c24_55], %99 {strides = array<i32>} : memref<8x32xf32, #tpu.memory_space<vmem>>, vector<8x8xf32>,
    %c0_56 = arith.constant 0 : index
    %c0_57 = arith.constant 0 : index
    %101 = vector.load %arg19[%c0_56, %c0_57] : memref<8x32xf32, #tpu.memory_space<vmem>>, vector<8x32xf32>
    %102 = arith.truncf %101 : vector<8x32xf32> to vector<8x32xbf16>
    %c0_58 = arith.constant 0 : index
    %c0_59 = arith.constant 0 : index
    %c0_60 = arith.constant 0 : index
    %103 = vector.load %arg6[%c0_58, %c0_59, %c0_60] : memref<1x32x32xbf16, #tpu.memory_space<vmem>>, vector<1x32x32xbf16>
    %104 = vector.shape_cast %103 : vector<1x32x32xbf16> to vector<32x32xbf16>
    %cst_61 = arith.constant dense<0.000000e+00> : vector<8x32xf32>
    %105 = tpu.matmul %102, %104, %cst_61 {dimension_numbers = #tpu.dot_dimension_numbers<[1], [0], [0], [1], [0, 0, 1, 1], [], []>} : vector<8x32xbf16>, vector<32x32xbf16>, vector<8x32xf32> -> vector<8x32xf32>
    %c0_62 = arith.constant 0 : index
    %c0_63 = arith.constant 0 : index
    %c0_64 = arith.constant 0 : index
    %106 = vector.load %arg7[%c0_62, %c0_63, %c0_64] : memref<1x1x32xf32, #tpu.memory_space<vmem>>, vector<1x1x32xf32>
    %107 = vector.shape_cast %106 : vector<1x1x32xf32> to vector<1x32xf32>
    %108 = vector.broadcast %107 : vector<1x32xf32> to vector<8x32xf32>
    %109 = arith.addf %105, %108 : vector<8x32xf32>
    %110 = arith.addf %3, %109 : vector<8x32xf32>
    %c0_65 = arith.constant 0 : index
    %c0_66 = arith.constant 0 : index
    %c0_67 = arith.constant 0 : index
    %111 = vector.load %arg8[%c0_65, %c0_66, %c0_67] : memref<1x1x32xf32, #tpu.memory_space<vmem>>, vector<1x1x32xf32>
    %112 = vector.shape_cast %111 : vector<1x1x32xf32> to vector<1x32xf32>
    %c0_68 = arith.constant 0 : index
    %c0_69 = arith.constant 0 : index
    %c0_70 = arith.constant 0 : index
    %113 = vector.load %arg9[%c0_68, %c0_69, %c0_70] : memref<1x1x32xf32, #tpu.memory_space<vmem>>, vector<1x1x32xf32>
    %114 = vector.shape_cast %113 : vector<1x1x32xf32> to vector<1x32xf32>
    %cst_71 = arith.constant dense<0.000000e+00> : vector<8xf32>
    %115 = vector.multi_reduction <add>, %110, %cst_71 [1] : vector<8x32xf32> to vector<8xf32>
    %116 = vector.shape_cast %115 : vector<8xf32> to vector<8x1xf32>
    %cst_72 = arith.constant 3.200000e+01 : f32
    %117 = vector.broadcast %cst_72 : f32 to vector<8x1xf32>
    %118 = arith.divf %116, %117 : vector<8x1xf32>
    %119 = arith.mulf %110, %110 : vector<8x32xf32>
    %cst_73 = arith.constant dense<0.000000e+00> : vector<8xf32>
    %120 = vector.multi_reduction <add>, %119, %cst_73 [1] : vector<8x32xf32> to vector<8xf32>
    %121 = vector.shape_cast %120 : vector<8xf32> to vector<8x1xf32>
    %cst_74 = arith.constant 3.200000e+01 : f32
    %122 = vector.broadcast %cst_74 : f32 to vector<8x1xf32>
    %123 = arith.divf %121, %122 : vector<8x1xf32>
    %124 = arith.mulf %118, %118 : vector<8x1xf32>
    %125 = arith.subf %123, %124 : vector<8x1xf32>
    %cst_75 = arith.constant 0.000000e+00 : f32
    %126 = vector.broadcast %cst_75 : f32 to vector<8x1xf32>
    %127 = arith.maximumf %125, %126 : vector<8x1xf32>
    %128 = vector.broadcast %118 : vector<8x1xf32> to vector<8x32xf32>
    %129 = arith.subf %110, %128 : vector<8x32xf32>
    %cst_76 = arith.constant 9.99999974E-6 : f32
    %130 = vector.broadcast %cst_76 : f32 to vector<8x1xf32>
    %131 = arith.addf %127, %130 : vector<8x1xf32>
    %132 = math.rsqrt %131 : vector<8x1xf32>
    %133 = vector.broadcast %132 : vector<8x1xf32> to vector<8x32xf32>
    %134 = arith.mulf %129, %133 : vector<8x32xf32>
    %135 = vector.broadcast %112 : vector<1x32xf32> to vector<8x32xf32>
    %136 = arith.mulf %134, %135 : vector<8x32xf32>
    %137 = vector.broadcast %114 : vector<1x32xf32> to vector<8x32xf32>
    %138 = arith.addf %136, %137 : vector<8x32xf32>
    %139 = arith.truncf %138 : vector<8x32xf32> to vector<8x32xbf16>
    %c0_77 = arith.constant 0 : index
    %c0_78 = arith.constant 0 : index
    %c0_79 = arith.constant 0 : index
    %140 = vector.load %arg10[%c0_77, %c0_78, %c0_79] : memref<1x32x128xbf16, #tpu.memory_space<vmem>>, vector<1x32x128xbf16>
    %141 = vector.shape_cast %140 : vector<1x32x128xbf16> to vector<32x128xbf16>
    %cst_80 = arith.constant dense<0.000000e+00> : vector<8x128xf32>
    %142 = tpu.matmul %139, %141, %cst_80 {dimension_numbers = #tpu.dot_dimension_numbers<[1], [0], [0], [1], [0, 0, 1, 1], [], []>} : vector<8x32xbf16>, vector<32x128xbf16>, vector<8x128xf32> -> vector<8x128xf32>
    %c0_81 = arith.constant 0 : index
    %c0_82 = arith.constant 0 : index
    %c0_83 = arith.constant 0 : index
    %143 = vector.load %arg11[%c0_81, %c0_82, %c0_83] : memref<1x1x128xf32, #tpu.memory_space<vmem>>, vector<1x1x128xf32>
    %144 = vector.shape_cast %143 : vector<1x1x128xf32> to vector<1x128xf32>
    %145 = vector.broadcast %144 : vector<1x128xf32> to vector<8x128xf32>
    %146 = arith.addf %142, %145 : vector<8x128xf32>
    %cst_84 = arith.constant 5.000000e-01 : f32
    %147 = vector.broadcast %cst_84 : f32 to vector<8x128xf32>
    %148 = arith.mulf %147, %146 : vector<8x128xf32>
    %cst_85 = arith.constant 4.471500e-02 : f32
    %149 = vector.broadcast %cst_85 : f32 to vector<8x128xf32>
    %150 = arith.mulf %149, %146 : vector<8x128xf32>
    %151 = arith.mulf %150, %146 : vector<8x128xf32>
    %152 = arith.mulf %151, %146 : vector<8x128xf32>
    %153 = arith.addf %146, %152 : vector<8x128xf32>
    %cst_86 = arith.constant 0.797884583 : f32
    %154 = vector.broadcast %cst_86 : f32 to vector<8x128xf32>
    %155 = arith.mulf %154, %153 : vector<8x128xf32>
    %156 = math.tanh %155 : vector<8x128xf32>
    %cst_87 = arith.constant 1.000000e+00 : f32
    %157 = vector.broadcast %cst_87 : f32 to vector<8x128xf32>
    %158 = arith.addf %157, %156 : vector<8x128xf32>
    %159 = arith.mulf %148, %158 : vector<8x128xf32>
    %160 = arith.truncf %159 : vector<8x128xf32> to vector<8x128xbf16>
    %c0_88 = arith.constant 0 : index
    %c0_89 = arith.constant 0 : index
    %c0_90 = arith.constant 0 : index
    %161 = vector.load %arg12[%c0_88, %c0_89, %c0_90] : memref<1x128x32xbf16, #tpu.memory_space<vmem>>, vector<1x128x32xbf16>
    %162 = vector.shape_cast %161 : vector<1x128x32xbf16> to vector<128x32xbf16>
    %cst_91 = arith.constant dense<0.000000e+00> : vector<8x32xf32>
    %163 = tpu.matmul %160, %162, %cst_91 {dimension_numbers = #tpu.dot_dimension_numbers<[1], [0], [0], [1], [0, 0, 1, 1], [], []>} : vector<8x128xbf16>, vector<128x32xbf16>, vector<8x32xf32> -> vector<8x32xf32>
    %164 = arith.addf %110, %163 : vector<8x32xf32>
    %c0_92 = arith.constant 0 : index
    %c0_93 = arith.constant 0 : index
    %c0_94 = arith.constant 0 : index
    %165 = vector.load %arg13[%c0_92, %c0_93, %c0_94] : memref<1x1x32xf32, #tpu.memory_space<vmem>>, vector<1x1x32xf32>
    %166 = vector.shape_cast %165 : vector<1x1x32xf32> to vector<1x32xf32>
    %167 = vector.broadcast %166 : vector<1x32xf32> to vector<8x32xf32>
    %168 = arith.addf %164, %167 : vector<8x32xf32>
    %c0_95 = arith.constant 0 : index
    %c0_96 = arith.constant 0 : index
    %169 = vector.load %arg17[%c0_95, %c0_96] : memref<8x32xf32, #tpu.memory_space<vmem>>, vector<8x32xf32>
    tpu.vector_store %arg17[%c0_95, %c0_96], %168 {strides = array<i32>} : memref<8x32xf32, #tpu.memory_space<vmem>>, vector<8x32xf32>,
    %c1_i32 = arith.constant 1 : i32
    %170 = arith.cmpi eq, %arg1, %c1_i32 : i32
    %171 = arith.extui %170 : i1 to i32
    %c0_i32_97 = arith.constant 0 : i32
    %172 = arith.cmpi ne, %171, %c0_i32_97 : i32
    scf.if %172 {
      %c0_98 = arith.constant 0 : index
      %c0_99 = arith.constant 0 : index
      %173 = vector.load %arg14[%c0_98, %c0_99] : memref<1x32xf32, #tpu.memory_space<vmem>>, vector<1x32xf32>
      %c0_100 = arith.constant 0 : index
      %c0_101 = arith.constant 0 : index
      %174 = vector.load %arg15[%c0_100, %c0_101] : memref<1x32xf32, #tpu.memory_space<vmem>>, vector<1x32xf32>
      %cst_102 = arith.constant dense<0.000000e+00> : vector<8xf32>
      %175 = vector.multi_reduction <add>, %168, %cst_102 [1] : vector<8x32xf32> to vector<8xf32>
      %176 = vector.shape_cast %175 : vector<8xf32> to vector<8x1xf32>
      %cst_103 = arith.constant 3.200000e+01 : f32
      %177 = vector.broadcast %cst_103 : f32 to vector<8x1xf32>
      %178 = arith.divf %176, %177 : vector<8x1xf32>
      %179 = arith.mulf %168, %168 : vector<8x32xf32>
      %cst_104 = arith.constant dense<0.000000e+00> : vector<8xf32>
      %180 = vector.multi_reduction <add>, %179, %cst_104 [1] : vector<8x32xf32> to vector<8xf32>
      %181 = vector.shape_cast %180 : vector<8xf32> to vector<8x1xf32>
      %cst_105 = arith.constant 3.200000e+01 : f32
      %182 = vector.broadcast %cst_105 : f32 to vector<8x1xf32>
      %183 = arith.divf %181, %182 : vector<8x1xf32>
      %184 = arith.mulf %178, %178 : vector<8x1xf32>
      %185 = arith.subf %183, %184 : vector<8x1xf32>
      %cst_106 = arith.constant 0.000000e+00 : f32
      %186 = vector.broadcast %cst_106 : f32 to vector<8x1xf32>
      %187 = arith.maximumf %185, %186 : vector<8x1xf32>
      %188 = vector.broadcast %178 : vector<8x1xf32> to vector<8x32xf32>
      %189 = arith.subf %168, %188 : vector<8x32xf32>
      %cst_107 = arith.constant 9.99999974E-6 : f32
      %190 = vector.broadcast %cst_107 : f32 to vector<8x1xf32>
      %191 = arith.addf %187, %190 : vector<8x1xf32>
      %192 = math.rsqrt %191 : vector<8x1xf32>
      %193 = vector.broadcast %192 : vector<8x1xf32> to vector<8x32xf32>
      %194 = arith.mulf %189, %193 : vector<8x32xf32>
      %195 = vector.broadcast %173 : vector<1x32xf32> to vector<8x32xf32>
      %196 = arith.mulf %194, %195 : vector<8x32xf32>
      %197 = vector.broadcast %174 : vector<1x32xf32> to vector<8x32xf32>
      %198 = arith.addf %196, %197 : vector<8x32xf32>
      %199 = vector.shape_cast %198 : vector<8x32xf32> to vector<1x8x32xf32>
      %c0_108 = arith.constant 0 : index
      %c0_109 = arith.constant 0 : index
      %c0_110 = arith.constant 0 : index
      %200 = vector.load %arg16[%c0_108, %c0_109, %c0_110] : memref<1x8x32xf32, #tpu.memory_space<vmem>>, vector<1x8x32xf32>
      tpu.vector_store %arg16[%c0_108, %c0_109, %c0_110], %199 {strides = array<i32>} : memref<1x8x32xf32, #tpu.memory_space<vmem>>, vector<1x8x32xf32>,
    } else {
    }
    return
  }
  func.func @transform_0(%arg0: i32, %arg1: i32) -> (i32, i32, i32) {
    %c0_i32 = arith.constant 0 : i32
    %c0_i32_0 = arith.constant 0 : i32
    %c0_i32_1 = arith.constant 0 : i32
    return %arg0, %c0_i32, %c0_i32_0 : i32, i32, i32
  }
  func.func @transform_1(%arg0: i32, %arg1: i32) -> (i32, i32, i32) {
    %c0_i32 = arith.constant 0 : i32
    %c0_i32_0 = arith.constant 0 : i32
    %c0_i32_1 = arith.constant 0 : i32
    return %arg1, %c0_i32, %c0_i32_0 : i32, i32, i32
  }
  func.func @transform_2(%arg0: i32, %arg1: i32) -> (i32, i32, i32) {
    %c0_i32 = arith.constant 0 : i32
    %c0_i32_0 = arith.constant 0 : i32
    %c0_i32_1 = arith.constant 0 : i32
    return %arg1, %c0_i32, %c0_i32_0 : i32, i32, i32
  }
  func.func @transform_3(%arg0: i32, %arg1: i32) -> (i32, i32, i32) {
    %c0_i32 = arith.constant 0 : i32
    %c0_i32_0 = arith.constant 0 : i32
    %c0_i32_1 = arith.constant 0 : i32
    return %arg1, %c0_i32, %c0_i32_0 : i32, i32, i32
  }
  func.func @transform_4(%arg0: i32, %arg1: i32) -> (i32, i32, i32) {
    %c0_i32 = arith.constant 0 : i32
    %c0_i32_0 = arith.constant 0 : i32
    %c0_i32_1 = arith.constant 0 : i32
    return %arg1, %c0_i32, %c0_i32_0 : i32, i32, i32
  }
  func.func @transform_5(%arg0: i32, %arg1: i32) -> (i32, i32, i32) {
    %c0_i32 = arith.constant 0 : i32
    %c0_i32_0 = arith.constant 0 : i32
    %c0_i32_1 = arith.constant 0 : i32
    return %arg1, %c0_i32, %c0_i32_0 : i32, i32, i32
  }
  func.func @transform_6(%arg0: i32, %arg1: i32) -> (i32, i32, i32) {
    %c0_i32 = arith.constant 0 : i32
    %c0_i32_0 = arith.constant 0 : i32
    %c0_i32_1 = arith.constant 0 : i32
    return %arg1, %c0_i32, %c0_i32_0 : i32, i32, i32
  }
  func.func @transform_7(%arg0: i32, %arg1: i32) -> (i32, i32, i32) {
    %c0_i32 = arith.constant 0 : i32
    %c0_i32_0 = arith.constant 0 : i32
    %c0_i32_1 = arith.constant 0 : i32
    return %arg1, %c0_i32, %c0_i32_0 : i32, i32, i32
  }
  func.func @transform_8(%arg0: i32, %arg1: i32) -> (i32, i32, i32) {
    %c0_i32 = arith.constant 0 : i32
    %c0_i32_0 = arith.constant 0 : i32
    %c0_i32_1 = arith.constant 0 : i32
    return %arg1, %c0_i32, %c0_i32_0 : i32, i32, i32
  }
  func.func @transform_9(%arg0: i32, %arg1: i32) -> (i32, i32, i32) {
    %c0_i32 = arith.constant 0 : i32
    %c0_i32_0 = arith.constant 0 : i32
    %c0_i32_1 = arith.constant 0 : i32
    return %arg1, %c0_i32, %c0_i32_0 : i32, i32, i32
  }
  func.func @transform_10(%arg0: i32, %arg1: i32) -> (i32, i32, i32) {
    %c0_i32 = arith.constant 0 : i32
    %c0_i32_0 = arith.constant 0 : i32
    %c0_i32_1 = arith.constant 0 : i32
    return %arg1, %c0_i32, %c0_i32_0 : i32, i32, i32
  }
  func.func @transform_11(%arg0: i32, %arg1: i32) -> (i32, i32, i32) {
    %c0_i32 = arith.constant 0 : i32
    %c0_i32_0 = arith.constant 0 : i32
    %c0_i32_1 = arith.constant 0 : i32
    return %arg1, %c0_i32, %c0_i32_0 : i32, i32, i32
  }
  func.func @transform_12(%arg0: i32, %arg1: i32) -> (i32, i32) {
    %c0_i32 = arith.constant 0 : i32
    %c0_i32_0 = arith.constant 0 : i32
    %c0_i32_1 = arith.constant 0 : i32
    return %c0_i32, %c0_i32_0 : i32, i32
  }
  func.func @transform_13(%arg0: i32, %arg1: i32) -> (i32, i32) {
    %c0_i32 = arith.constant 0 : i32
    %c0_i32_0 = arith.constant 0 : i32
    %c0_i32_1 = arith.constant 0 : i32
    return %c0_i32, %c0_i32_0 : i32, i32
  }
  func.func @transform_14(%arg0: i32, %arg1: i32) -> (i32, i32, i32) {
    %c0_i32 = arith.constant 0 : i32
    %c0_i32_0 = arith.constant 0 : i32
    %c0_i32_1 = arith.constant 0 : i32
    return %arg0, %c0_i32, %c0_i32_0 : i32, i32, i32
  }
}

</mosaic_0001>

<bundles_post_ra>
// kernel: mask_transformer_forward.3
= control target key start
LH: loop header
LB: loop body
LE: loop exit
PB: predicated region body
PF: predicated region fallthrough
CT: control target
= control target key end

     0   :  { %8 = vsyncpa [#allocation3], 0  ;;  %s703_s0 = inlined_call_operand.vmem [shape: f32[2,8,32], index: 0, kind: input, shape index: {}]   ;;  %s704_s1 = inlined_call_operand.vmem [shape: bf16[32,128], index: 1, kind: input, shape index: {}]   ;;  %s705_s2 = inlined_call_operand.vmem [shape: f32[1,128], index: 2, kind: input, shape index: {}]   ;;  %s706_s3 = inlined_call_operand.hbm [shape: f32[2,8,128], index: 3, kind: output, shape index: {}]  }
   0x1   :  { %10 = vsyncpa [#allocation3 + $0x1], 0  ;;  %s582_s12 = smov 0   ;;  %s584_s13 = smov 0  }
   0x2   :  { %s586_s14 = smov 0   ;;  %s588_s15 = smov 0  }
   0x3   :  { %s590_s16 = smov 0   ;;  %s592_s17 = smov 0  }
   0x4 LB: > { %s392_s18 = sadd.s32 4294967295, %s557_s17   ;;  %s393_s19 = sadd.s32 4294967294, %s557_s17   ;;  %s557_s17 = sphi %s592_s17, %s16_s17   ;;  %s553_s16 = sphi %s590_s16, %s713_s16   ;;  %s549_s15 = sphi %s588_s15, %s712_s15   ;;  %s545_s14 = sphi %s586_s14, %s711_s14   ;;  %s541_s13 = sphi %s584_s13, %s710_s13   ;;  %s537_s12 = sphi %s582_s12, %s709_s12  }
   0x5   : > { %s28_s20 = sadd.s32 1, %s553_s16  ;;  %s115_s21 = sadd.s32 1, %s545_s14 }
   0x6   : > { %p30_p0 = scmp.ge.s32.totalorder %s28_s20, 2  ;;  %p125_p1 = scmp.ne.s32.totalorder %s545_s14, %s541_s13 }
   0x7   : > { %p126_p2 = scmp.eq.s32.totalorder %s392_s18, 1  ;;  %p131_p3 = scmp.ne.s32.totalorder %s541_s13, %s537_s12 }
   0x8   : > { %s715_s20 = smov (%p30_p0, %s28_s20), 0  ;;  %p132_p5 = scmp.eq.s32.totalorder %s393_s19, 1 }
   0x9   : > { %p622_p4 = por %p126_p2, %p125_p1  ;;  %s110_s23 = ssub.s32 %s553_s16, %s715_s20 }
   0xa   : > { %p398_p6 = scmp.ge.s32.totalorder %s557_s17, 1  ;;  %p113_p7 = scmp.eq.s32.totalorder %s110_s23, 0 }
   0xb   : > { %p629_p8 = por %p132_p5, %p131_p3  ;;  %p170_p9 = scmp.lt.s32.totalorder %s557_s17, 3 }
   0xc   : > { %s635_s25 = scalar_select %p113_p7, %s545_s14, %s115_s21  }
   0xd   : > { %p171_p10 = pnand %p398_p6, %p170_p9 }
   0xe   : > { %v477_v0 = vld [vmem:[%s704_s1] sm:$0xff] (!%p171_p10)   ;;  %v559_v1 = vmov (!%p171_p10), 0.0   ;;  %v478_v2 = vld [vmem:[%s704_s1 + $0x8] sm:$0xff] (!%p171_p10)   ;;  %vm560_vm0 = vmmov (!%p171_p10), 0   ;;  %p200_p11 = scmp.lt.s32.totalorder (!%p171_p10), %s549_s15, 1  ;;  %vm237_vm1 = vcmask (!%p171_p10), 261120  }
   0xf   : > { %174 = sbr.rel (%p171_p10) target bundleno = 257 (0x101), region = 32  ;;  %412 = vmatprep.subr.bf16.mxu0 (!%p171_p10), %v559_v1  ;;  %416 = vmatprep.mubr.msk.bf16.mxu0 (!%p171_p10), %vm560_vm0, %v559_v1  ;;  %s197_s8 = sand.u32 (!%p171_p10), 1, %s541_s13   ;;  %v401_v5 = vld [vmem:[%s705_s2] ss:$0 sm:$0xff] (!%p171_p10) }
  0x10   : > { %413 = vmatpush3.bf16.msra.mxu0 (!%p171_p10), %v477_v0  ;;  %s399_s9 = sshll.u32 (!%p171_p10), %s197_s8, 3  ;;  %s406_s18 = sshll.u32 (!%p171_p10), %s549_s15, 7 }
  0x11   : > { %414 = vmatprep.subr.bf16.mxu0 (!%p171_p10), %v559_v1  ;;  %s199_s19 = scalar_lea.vmem (!%p171_p10), [#allocation2], %s399_s9  ;;  %s656_s27 = scalar_lea.hbm (!%p171_p10), %s706_s3, %s406_s18 }
  0x12   : > { %s297_s21 = sshll.u32 (!%p171_p10), %s199_s19, 4  ;;  %s283_s28 = scalar_lea.sflag (!%p171_p10), [#allocation3], %s197_s8  ;;  %s658_s21 = int_to_ptr.vmem [resolvable:$true] %s297_s21 }
  0x13   : > { %s561_s29 = smov (!%p171_p10), [#allocation2]  }
  0x14   : > { %415 = vmatpush3.bf16.msra.mxu0 (!%p171_p10), %v478_v2 }
  0x16   : > { %s201_s30 = scalar_select %p200_p11, %s549_s15, 1 }
  0x17   : > { %s479_s15 = scalar_lea.vmem %s658_s21, 128 }
  0x18   : > { %s400_s4 = sshll.u32 %s201_s30, 3  ;;  %p480_p12 = scmp.ne.s32.totalorder %s658_s21, %s479_s15 }
  0x19   : > { %s203_s7 = scalar_lea.vmem %s703_s0, %s400_s4  ;;  %s483_s30 = sshll.u32 %s561_s29, 4  ;;  %s484_s30 = int_to_ptr.vmem [resolvable:$false] %s483_s30 }
  0x1a   : > { %v216_v3 = vld [vmem:[%s203_s7] sm:$0xff]  ;;  %p481_p13 = pnand %p480_p12, %p622_p4  ;;  %s485_s4 = scalar_lea.vmem %s484_s30, 256 }
  0x1b   : > { %v217_v4 = vpack.c.bf16 %v216_v3, %v216_v3  ;;  %p486_p1 = scmp.lt.s32.totalorder %s658_s21, %s484_s30  ;;  %p487_p2 = scmp.lt.s32.totalorder %s485_s4, %s479_s15 }
  0x1c   : > { %p482_p0 = pneg %p481_p13 }
  0x1d   : > { %417 = vmatmul.mubr.msk.bf16.vlgmr.msra.gmra.mrb[0].mxu0 %vm237_vm1, %v217_v4  ;;  %p488_p3 = por %p487_p2, %p486_p1 }
  0x1f   : > { %p489_p5 = pnand %p488_p3, %p482_p0 }
  0xf0   : > { %v275_v6 = vpop.f32.mrb[0].mxu0 }
  0xf1   : > { %v276_v7 = vadd.f32 %v401_v5, %v275_v6  ;;  %v418_v8 = vpop.f32.mrb[1].mxu0 }
  0xf2   : > { %v278_v9 = vpop.f32.mrb[2].mxu0 }
  0xf3   : > { %281 = vst [vmem:[%s199_s19] sm:$0xff] %v276_v7  ;;  %v419_v10 = vpop.f32.mrb[3].mxu0 }
  0xf4   : > { %492 = shalt.err (!%p489_p5)
}
  0xf5   : > { %s493_s5 = scalar_lea.hbm %s656_s27, 128  ;;  %s497_s8 = scalar_lea.hbm %s706_s3, 256 }
  0xf6   : > { %p494_p6 = scmp.ne.s32.totalorder %s656_s27, %s493_s5  ;;  %p498_p10 = scmp.lt.u32.totalorder %s656_s27, %s706_s3 }
  0xf7   : > { %p499_p11 = scmp.lt.u32.totalorder %s497_s8, %s493_s5  ;;  %p501_p13 = scmp.lt.u32.totalorder %s493_s5, %s656_s27 }
  0xf8   : > { %p495_p7 = pnand %p494_p6, %p622_p4 }
  0xf9   : > { %p500_p12 = por %p499_p11, %p498_p10 }
  0xfa   : > { %p496_p9 = pneg %p495_p7 }
  0xfb   : > { %p502_p0 = por %p501_p13, %p500_p12 }
  0xfd   : > { %p503_p1 = pnand %p502_p0, %p496_p9 }
  0xff   : > { %506 = shalt.err (!%p503_p1)
}
 0x100   : > { %420 = dma.vmem_to_hbm [thread:$0]  (%p622_p4), %s658_s21, 128, %s656_s27, %s283_s28  }
 0x101 PF: > { %p426_p2 = scmp.ge.s32.totalorder %s557_s17, 2  ;;  %s309_s11 = sand.u32 1, %s537_s12  }
 0x102   : > { %s310_s18 = scalar_lea.sflag [#allocation3], %s309_s11 }
 0x103   : > { %p423_p3 = pnand %p426_p2, %p629_p8 }
 0x105   : > { %532 = dma.done.wait (!%p423_p3), %s310_s18, 128  }
 0x106   : > { %534 = vsyncadd (!%p423_p3), %s310_s18, 4294967168  ;;  %s16_s17 = sadd.s32 1, %s557_s17   ;;  %s709_s12 = smov %s541_s13 }
 0x107   : > { %p13_p5 = scmp.ge.s32.totalorder %s16_s17, 4   ;;  %s710_s13 = smov %s545_s14 }
 0x108   : > { %s711_s14 = smov %s635_s25  ;;  %s712_s15 = smov %s553_s16 }
 0x109   : > { %s713_s16 = smov %s715_s20  ;;  %15 = sbr.rel (!%p13_p5) target bundleno = 4 (0x4), region = 73 }
 0x110   :  { %315 = vsyncpa [#allocation3], 1 }
 0x111   :  { %317 = vsyncpa [#allocation3 + $0x1], 1 }

// kernel: mask_transformer_forward.2
= control target key start
LH: loop header
LB: loop body
LE: loop exit
PB: predicated region body
PF: predicated region fallthrough
CT: control target
= control target key end

     0   :  { %s2352_s29 = smov 0   ;;  %s2354_s30 = smov 0   ;;  %s2621_s0 = inlined_call_operand.vmem [shape: f32[2,8,32], index: 0, kind: input, shape index: {}]   ;;  %s2622_s1 = inlined_call_operand.vmem [shape: f32[2,1,32], index: 1, kind: input, shape index: {}]   ;;  %s2623_s2 = inlined_call_operand.vmem [shape: f32[2,1,32], index: 2, kind: input, shape index: {}]   ;;  %s2624_s3 = inlined_call_operand.vmem [shape: bf16[2,32,96], index: 3, kind: input, shape index: {}]   ;;  %s2625_s4 = inlined_call_operand.vmem [shape: bf16[2,32,32], index: 4, kind: input, shape index: {}]   ;;  %s2626_s5 = inlined_call_operand.vmem [shape: f32[2,1,32], index: 5, kind: input, shape index: {}]   ;;  %s2627_s6 = inlined_call_operand.vmem [shape: f32[2,1,32], index: 6, kind: input, shape index: {}]   ;;  %s2628_s7 = inlined_call_operand.vmem [shape: f32[2,1,32], index: 7, kind: input, shape index: {}]   ;;  %s2629_s8 = inlined_call_operand.vmem [shape: bf16[2,32,128], index: 8, kind: input, shape index: {}]   ;;  %s2630_s9 = inlined_call_operand.vmem [shape: f32[2,1,128], index: 9, kind: input, shape index: {}]   ;;  %s2631_s10 = inlined_call_operand.vmem [shape: bf16[2,128,32], index: 10, kind: input, shape index: {}]   ;;  %s2632_s11 = inlined_call_operand.vmem [shape: f32[2,1,32], index: 11, kind: input, shape index: {}]   ;;  %s2633_s12 = inlined_call_operand.vmem [shape: f32[1,32], index: 12, kind: input, shape index: {}]   ;;  %s2634_s13 = inlined_call_operand.vmem [shape: f32[1,32], index: 13, kind: input, shape index: {}]   ;;  %s2635_s14 = inlined_call_operand.vmem [shape: f32[2,8,32], index: 14, kind: output, shape index: {}]  }
   0x1   :  { %2640 = sst [smem:[#allocation11_spill]] %s2621_s0  ;;  %s2356_s15 = smov 0  }
   0x2   :  { %2641 = sst [smem:[#allocation12_spill]] %s2623_s2  ;;  %s2358_s16 = smov 0  }
   0x3   :  { %2642 = sst [smem:[#allocation13_spill]] %s2624_s3  ;;  %s2360_s17 = smov 0  }
   0x4   :  { %2643 = sst [smem:[#allocation14_spill]] %s2625_s4 }
   0x5   :  { %2644 = sst [smem:[#allocation15_spill]] %s2633_s12 }
   0x6   :  { %2645 = sst [smem:[#allocation16_spill]] %s2634_s13 }
   0x7 LB: > { %2646 = sst [smem:[#allocation5_spill]] %s2243_s29  ;;  %s33_s18 = sadd.s32 1, %s2251_s15  ;;  %s2259_s17 = sphi %s2360_s17, %s24_s17   ;;  %s2255_s16 = sphi %s2358_s16, %s2669_s16   ;;  %s2251_s15 = sphi %s2356_s15, %s2668_s15   ;;  %s2247_s30 = sphi %s2354_s30, %s2667_s30   ;;  %s2243_s29 = sphi %s2352_s29, %s2666_s29  }
   0x8   : > { %2647 = sst [smem:[#allocation6_spill]] %s2251_s15  ;;  %s36_s19 = sadd.s32 1, %s2255_s16 }
   0x9   : > { %2648 = sst [smem:[#allocation7_spill]] %s2255_s16  ;;  %p34_p0 = scmp.ge.s32.totalorder %s33_s18, 2 }
   0xa   : > { %2649 = sst [smem:[#allocation8_spill]] %s2259_s17  ;;  %p1952_p1 = scmp.ge.s32.totalorder %s2259_s17, 1 }
   0xb   : > { %p519_p2 = scmp.lt.s32.totalorder %s2259_s17, 5  ;;  %s2671_s18 = smov (%p34_p0, %s33_s18), 0 }
   0xc   : > { %2650 = sst [smem:[#allocation9_spill]] %s2671_s18  ;;  %s2673_s19 = smov (!%p34_p0, %s36_s19), %s2255_s16 }
   0xd   : > { %p520_p3 = pnand %p1952_p1, %p519_p2  ;;  %p38_p4 = scmp.ge.s32.totalorder %s2673_s19, 2 }
   0xe   : > { %p604_p5 = scmp.lt.s32.totalorder (!%p520_p3), %s2247_s30, 1  ;;  %p608_p6 = scmp.lt.s32.totalorder (!%p520_p3), %s2243_s29, 1 }
   0xf   : > { %s2675_s19 = smov (%p38_p4, %s2673_s19), 0  ;;  %523 = sbr.rel (%p520_p3) target bundleno = 2977 (0xba1), region = 76 }
  0x10   : > { %2651 = sst [smem:[#allocation10_spill]] %s2675_s19  ;;  %s2652_s0 = sld [smem:[#allocation11_spill]] (!%p520_p3) }
  0x11   : > { %s2654_s3 = sld [smem:[#allocation13_spill]] (!%p520_p3)  ;;  %s2655_s4 = sld [smem:[#allocation14_spill]] (!%p520_p3) }
  0x16   : > { %s2677_s30 = smov (!%p604_p5, %s2247_s30), 1 }
  0x17   : > { %s2386_s20 = scalar_select %p608_p6, %s2243_s29, 1 }
  0x18   : > { %s1953_s21 = sshll.u32 %s2677_s30, 3 }
  0x19   : > { %s607_s24 = scalar_lea.vmem %s2652_s0, %s1953_s21  ;;  %s2005_s16 = sshll.u32 %s2386_s20, 4 }
  0x1a   : > { %s618_s13 = scalar_lea.vmem %s2654_s3, %s2005_s16  ;;  %s2406_s30 = scalar_lea.vmem %s2655_s4, %s2005_s16 }
  0x1b   : > { %s629_s27 = scalar_lea.vmem %s2627_s6, %s2386_s20  ;;  %s2423_s17 = scalar_lea.vmem %s2629_s8, %s2005_s16 }
  0x1c   : > { %s640_s3 = scalar_lea.vmem %s2630_s9, %s2386_s20  ;;  %s2008_s4 = sshll.u32 %s2386_s20, 6 }
  0x1d   : > { %s2433_s0 = scalar_lea.vmem %s2631_s10, %s2008_s4  ;;  %s648_s19 = scalar_lea.vmem %s2632_s11, %s2386_s20 }
  0x1e   : > { %s2442_s2 = scalar_lea.vmem %s2635_s14, %s1953_s21  ;;  %s2656_s16 = sld [smem:[#allocation5_spill]] }
  0x24   : > { %p1963_p7 = scmp.ne.s32.totalorder %s2656_s16, 0 }
  0x25   : > { %v658_v0 = vld [vmem:[%s607_s24] sm:$0xff] (!%p1963_p7)  ;;  %vm659_vm0 = vcmask (!%p1963_p7), 261120  }
  0x26   : > { %657 = sbr.rel (%p1963_p7) target bundleno = 45 (0x2d), region = 80  ;;  %660 = vst.msk [vmem:[#allocation2] sm:$0xff] (!%p1963_p7), %vm659_vm0, %v658_v0 }
  0x2d PF: > { %v2445_v1 = vld [vmem:[#allocation2] sm:$0xff]  ;;  %vm668_vm1 = vcmask 261120   ;;  %v2261_v6 = vmov 0.0   ;;  %vm2262_vm2 = vmmov 0   ;;  %v2184_v7 = vld [vmem:[%s618_s13 + $0x8] sm:$0xff]   ;;  %s2657_s18 = scalar_lea.vmem %s2622_s1, %s2386_s20  ;;  %s2658_s15 = sld [smem:[#allocation12_spill]] }
  0x2e   : > { %v669_v2 = vsel %vm668_vm1, %v2445_v1, 0.0  ;;  %v674_v3 = vmul.f32 %v2445_v1, %v2445_v1  ;;  %v2183_v5 = vld [vmem:[%s618_s13] sm:$0xff]   ;;  %2043 = vmatprep.subr.bf16.mxu0 %v2261_v6  ;;  %2047 = vmatprep.mubr.msk.bf16.mxu0 %vm2262_vm2, %v2261_v6  ;;  %vm756_vm3 = vcmask 785408   ;;  %s2263_s29 = smov 64   ;;  %s2264_s22 = smov 96   ;;  %vm762_vm4 = vcmask 64512  }
  0x2f   : > { %670 = vadd.xlane.f32.xlu0 %v669_v2  ;;  %2044 = vmatpush3.bf16.msra.mxu0 %v2183_v5  ;;  %v1964_v18 = vld [vmem:[%s2657_s18] ss:$0 sm:$0xff]  ;;  %s2265_s23 = smov 88   ;;  %s2266_s25 = smov 120   ;;  %vm1096_vm5 = vcmask 130112   ;;  %vm1269_vm6 = vcmask 195712  }
  0x30   : > { %v675_v4 = vsel %vm668_vm1, %v674_v3, 0.0  ;;  %2056 = vmatprep.subr.mxu1 %v2261_v6  ;;  %2045 = vmatprep.subr.bf16.mxu0 %v2261_v6  ;;  %s2267_s26 = smov 80   ;;  %s2268_s28 = smov 112   ;;  %vm1442_vm7 = vcmask 261312  }
  0x31   : > { %2058 = vmatprep.mubr.msk.f32.mxu1 %vm2262_vm2, %v2261_v6  ;;  %s2269_s16 = smov 72   ;;  %s2270_s4 = smov 104  }
  0x32   : > { %s2271_s13 = smov 48   ;;  %s2272_s18 = smov 40  }
  0x33   : > { %676 = vadd.xlane.f32.xlu0 %v675_v4  ;;  %2046 = vmatpush3.bf16.msra.mxu0 %v2184_v7  ;;  %s2659_s12 = scalar_lea.vmem %s2658_s15, %s2386_s20  ;;  %s2273_s21 = smov 56  }
  0x34   : > { %2051 = vmatprep.subr.mxu0 %v2261_v6  ;;  %v1965_v20 = vld [vmem:[%s2659_s12] ss:$0 sm:$0xff]  ;;  %s2274_s24 = smov 8   ;;  %s2275_s15 = smov 16  }
  0x35   : > { %s2276_s12 = smov 24  }
  0xbc   : > { %v671_v8 = vpop.xlane.xlu0 %670 }
  0xbd   : > { %v673_v9 = vmul.f32 0.03125, %v671_v8 }
  0xbf   : > { %v679_v11 = vmul.f32 %v673_v9, %v673_v9  ;;  %v682_v16 = vsub.f32 %v2445_v1, %v673_v9 }
  0xc0   : > { %v677_v10 = vpop.xlane.xlu0 %676 }
  0xc1   : > { %v678_v12 = vmul.f32 0.03125, %v677_v10 }
  0xc3   : > { %v680_v13 = vsub.f32 %v678_v12, %v679_v11 }
  0xc5   : > { %v681_v14 = vmax.f32 %v680_v13, 0.0 }
  0xc7   : > { %v683_v15 = vadd.f32 1e-05, %v681_v14 }
  0xc9   : > { %2197 = vrsqrt.f32 %v683_v15 }
  0xd3   : > { %v2198_v17 = vpop.eup %2197 }
  0xd4   : > { %v685_v19 = vmul.f32 %v2198_v17, %v682_v16 }
  0xd6   : > { %v692_v21 = vmul.f32 %v1964_v18, %v685_v19 }
  0xd8   : > { %v699_v22 = vadd.f32 %v1965_v20, %v692_v21 }
  0xda   : > { %v700_v23 = vpack.c.bf16 %v699_v22, %v699_v22 }
  0xdc   : > { %2048 = vmatmul.mubr.msk.bf16.vlgmr.msra.gmra.mrb[0].mxu0 %vm668_vm1, %v700_v23 }
  0xdd   : > { %2053 = vmatprep.mubr.msk.f32.mxu0 %vm2262_vm2, %v2261_v6 }
 0x1af   : > { %v750_v24 = vpop.f32.mrb[0].mxu0 }
 0x1b0   : > { %757 = vst.msk [vmem:[#allocation3] sm:$0xff] %vm756_vm3, %v750_v24  ;;  %v2049_v25 = vpop.f32.mrb[1].mxu0  ;;  %v2185_v24 = vld [vmem:[%s2406_s30] sm:$0xff]  }
 0x1b1   : > { %v753_v26 = vpop.f32.mrb[2].mxu0  ;;  %v2186_v25 = vld [vmem:[%s2406_s30 + $0x8] sm:$0xff]  }
 0x1b2   : > { %v2050_v27 = vpop.f32.mrb[3].mxu0 }
 0x1b7   : > { %v2474_v28 = vld [vmem:[#allocation3] sm:$0xff] }
 0x1b8   : > { %848 = vrot.lane.b32.xlu0 %v2474_v28, %s2263_s29  ;;  %760 = vrot.lane.b32.xlu1 %v2474_v28, %s2264_s22  ;;  %s2660_s22 = scalar_lea.vmem %s2626_s5, %s2386_s20 }
 0x1bc   : > { %929 = vrot.lane.b32.xlu0 %v2474_v28, %s2265_s23 }
 0x1c0   : > { %927 = vrot.lane.b32.xlu0 %v2474_v28, %s2266_s25 }
 0x22a   : > { %v849_v29 = vpop.permute.xlu0 %848  ;;  %v761_v30 = vpop.permute.xlu1 %760 }
 0x22b   : > { %2052 = vmatpush3.xpose.msk.msra.mxu0 %vm762_vm4, %v761_v30  ;;  %2057 = vmatpush3.msra.mxu1 %v849_v29 }
 0x22c   : > { %2061 = vmatprep.subr.mxu1 %v2261_v6  ;;  %2066 = vmatprep.subr.mxu0 %v2261_v6 }
 0x22e   : > { %2054 = vmatmul.mubr.msk.f32.vlgmr.msra.gmra.mrb[4].mxu0 %vm762_vm4, %v2474_v28  ;;  %v930_v39 = vpop.permute.xlu0 %929 }
 0x22f   : > { %2068 = vmatprep.mubr.msk.f32.mxu0 %vm2262_vm2, %v2261_v6 }
 0x232   : > { %v928_v40 = vpop.permute.xlu0 %927 }
 0x301   : > { %v833_v31 = vpop.f32.mrb[4].mxu0 }
 0x302   : > { %v2055_v32 = vpop.f32.mrb[5].mxu0  ;;  %v837_v33 = vsel %vm762_vm4, %v833_v31, -inf }
 0x303   : > { %838 = vmax.xlane.f32.xlu1 %v837_v33 }
 0x314   : > { %1102 = vrot.lane.b32.xlu1 %v2474_v28, %s2267_s26 }
 0x390   : > { %v839_v34 = vpop.xlane.xlu1 %838 }
 0x391   : > { %v840_v35 = vsub.f32 %v833_v31, %v839_v34 }
 0x393   : > { %v841_v36 = vmul.f32 1.442695, %v840_v35 }
 0x394   : > { %v1103_v45 = vpop.permute.xlu1 %1102 }
 0x395   : > { %2199 = vpow2.f32 %v841_v36 }
 0x39f   : > { %v2200_v37 = vpop.eup %2199 }
 0x3a0   : > { %v843_v38 = vsel %vm762_vm4, %v2200_v37, 0.0 }
 0x3a1   : > { %844 = vadd.xlane.f32.xlu0 %v843_v38 }
 0x3b7   : > { %1100 = vrot.lane.b32.xlu0 %v2474_v28, %s2268_s28  ;;  %s2661_s28 = scalar_lea.vmem %s2628_s7, %s2386_s20 }
 0x3bb   : > { %1275 = vrot.lane.b32.xlu0 %v2474_v28, %s2269_s16 }
 0x3bf   : > { %1273 = vrot.lane.b32.xlu0 %v2474_v28, %s2270_s4  ;;  %s2662_s4 = sld [smem:[#allocation5_spill]] }
 0x3c5   : > { %p2000_p8 = scmp.ne.s32.totalorder %s2662_s4, 1 }
 0x42e   : > { %v845_v41 = vpop.xlane.xlu0 %844 }
 0x42f   : > { %2201 = vrcp.f32 %v845_v41 }
 0x432   : > { %v1101_v44 = vpop.permute.xlu0 %1100 }
 0x436   : > { %v1276_v46 = vpop.permute.xlu0 %1275 }
 0x439   : > { %v2202_v42 = vpop.eup %2201 }
 0x43a   : > { %v847_v43 = vmul.f32 %v2202_v42, %v2200_v37  ;;  %v1274_v47 = vpop.permute.xlu0 %1273  ;;  %v1981_v37 = vld [vmem:[%s2660_s22] ss:$0 sm:$0xff] }
 0x43c   : > { %2059 = vmatmul.mubr.msk.f32.vlgmr.msra.gmra.mrb[0].mxu1 %vm762_vm4, %v847_v43 }
 0x43d   : > { %2062 = vmatpush3.xpose.msk.msra.mxu1 %vm762_vm4, %v930_v39  ;;  %2063 = vmatprep.mubr.msk.f32.mxu1 %vm2262_vm2, %v2261_v6 }
 0x43e   : > { %2071 = vmatprep.subr.mxu1 %v2261_v6 }
 0x440   : > { %2064 = vmatmul.mubr.msk.f32.vlgmr.msra.gmra.mrb[2].mxu1 %vm762_vm4, %v928_v40 }
 0x441   : > { %2072 = vmatpush3.xpose.msk.msra.mxu1 %vm762_vm4, %v1103_v45  ;;  %2073 = vmatprep.mubr.msk.f32.mxu1 %vm2262_vm2, %v2261_v6 }
 0x442   : > { %2081 = vmatprep.subr.mxu1 %v2261_v6 }
 0x444   : > { %2074 = vmatmul.mubr.msk.f32.vlgmr.msra.gmra.mrb[4].mxu1 %vm762_vm4, %v1101_v44 }
 0x445   : > { %2082 = vmatpush3.xpose.msk.msra.mxu1 %vm762_vm4, %v1276_v46  ;;  %2083 = vmatprep.mubr.msk.f32.mxu1 %vm2262_vm2, %v2261_v6 }
 0x446   : > { %2107 = vmatprep.subr.bf16.mxu1 %v2261_v6 }
 0x448   : > { %2084 = vmatmul.mubr.msk.f32.vlgmr.msra.gmra.mrb[6].mxu1 %vm762_vm4, %v1274_v47  ;;  %v2187_v47 = vld [vmem:[%s2423_s17] sm:$0xff]  }
 0x449   : > { %2123 = vmatprep.mubr.msk.bf16.mxu1 %vm2262_vm2, %v2261_v6 }
 0x50f   : > { %v920_v48 = vpop.f32.mrb[0].mxu1 }
 0x510   : > { %924 = vst.msk [vmem:[#allocation4] sm:$0xff] %vm762_vm4, %v920_v48  ;;  %v2060_v49 = vpop.f32.mrb[1].mxu1  ;;  %v2188_v48 = vld [vmem:[%s2423_s17 + $0x8] sm:$0xff]  }
 0x513   : > { %v1001_v50 = vpop.f32.mrb[2].mxu1 }
 0x514   : > { %v2065_v51 = vpop.f32.mrb[3].mxu1  ;;  %v1005_v52 = vsel %vm762_vm4, %v1001_v50, -inf }
 0x515   : > { %1006 = vmax.xlane.f32.xlu0 %v1005_v52 }
 0x517   : > { %v1174_v53 = vpop.f32.mrb[4].mxu1 }
 0x518   : > { %v2075_v54 = vpop.f32.mrb[5].mxu1  ;;  %v1178_v55 = vsel %vm762_vm4, %v1174_v53, -inf }
 0x519   : > { %1179 = vmax.xlane.f32.xlu1 %v1178_v55 }
 0x51b   : > { %v1347_v56 = vpop.f32.mrb[6].mxu1 }
 0x51c   : > { %v2085_v57 = vpop.f32.mrb[7].mxu1  ;;  %v1351_v58 = vsel %vm762_vm4, %v1347_v56, -inf }
 0x51d   : > { %1352 = vmax.xlane.f32.xlu0 %v1351_v58 }
 0x52a   : > { %1189 = vrot.lane.b32.xlu1 %v2474_v28, %s2271_s13  ;;  %s2663_s13 = sld [smem:[#allocation15_spill]] (!%p2000_p8) }
 0x5a2   : > { %v1007_v59 = vpop.xlane.xlu0 %1006 }
 0x5a3   : > { %v1008_v60 = vsub.f32 %v1001_v50, %v1007_v59  ;;  %v1985_v59 = vld [vmem:[%s629_s27] ss:$0 sm:$0xff] }
 0x5a5   : > { %v1009_v61 = vmul.f32 1.442695, %v1008_v60 }
 0x5a6   : > { %v1180_v62 = vpop.xlane.xlu1 %1179 }
 0x5a7   : > { %2203 = vpow2.f32 %v1009_v61  ;;  %v1181_v63 = vsub.f32 %v1174_v53, %v1180_v62  ;;  %v1986_v61 = vld [vmem:[%s2661_s28] ss:$0 sm:$0xff] }
 0x5a9   : > { %v1182_v0 = vmul.f32 1.442695, %v1181_v63 }
 0x5aa   : > { %v1353_v2 = vpop.xlane.xlu0 %1352  ;;  %v1190_v13 = vpop.permute.xlu1 %1189 }
 0x5ab   : > { %2205 = vpow2.f32 %v1182_v0  ;;  %v1354_v3 = vsub.f32 %v1347_v56, %v1353_v2  ;;  %v2190_v2 = vld [vmem:[%s2433_s0 + $0x8] sm:$0xff]  }
 0x5ad   : > { %v1355_v4 = vmul.f32 1.442695, %v1354_v3  ;;  %v2191_v3 = vld [vmem:[%s2433_s0 + $0x10] sm:$0xff]  }
 0x5af   : > { %2207 = vpow2.f32 %v1355_v4  ;;  %v2192_v4 = vld [vmem:[%s2433_s0 + $0x18] sm:$0xff]  }
 0x5b1   : > { %v2204_v5 = vpop.eup %2203 }
 0x5b2   : > { %v1011_v7 = vsel %vm762_vm4, %v2204_v5, 0.0 }
 0x5b3   : > { %1012 = vadd.xlane.f32.xlu0 %v1011_v7  ;;  %v2194_v7 = vld [vmem:[%s2433_s0 + $0x28] sm:$0xff]  }
 0x5b5   : > { %v2206_v8 = vpop.eup %2205 }
 0x5b6   : > { %v1184_v9 = vsel %vm762_vm4, %v2206_v8, 0.0 }
 0x5b7   : > { %1185 = vadd.xlane.f32.xlu0 %v1184_v9  ;;  %v2196_v9 = vld [vmem:[%s2433_s0 + $0x38] sm:$0xff]  }
 0x5b9   : > { %v2208_v10 = vpop.eup %2207 }
 0x5ba   : > { %v1357_v11 = vsel %vm762_vm4, %v2208_v10, 0.0 }
 0x5bb   : > { %1358 = vadd.xlane.f32.xlu1 %v1357_v11 }
 0x5cc   : > { %1362 = vrot.lane.b32.xlu1 %v2474_v28, %s2272_s18 }
 0x5cd   : > { %1016 = vrot.lane.b32.xlu0 %v2474_v28, %s2273_s21 }
 0x640   : > { %v1013_v12 = vpop.xlane.xlu0 %1012 }
 0x641   : > { %2209 = vrcp.f32 %v1013_v12 }
 0x644   : > { %v1186_v14 = vpop.xlane.xlu0 %1185 }
 0x645   : > { %2211 = vrcp.f32 %v1186_v14 }
 0x648   : > { %v1359_v15 = vpop.xlane.xlu1 %1358  ;;  %v1017_v16 = vpop.permute.xlu0 %1016 }
 0x649   : > { %2213 = vrcp.f32 %v1359_v15  ;;  %2067 = vmatpush3.msra.mxu0 %v1017_v16 }
 0x64a   : > { %2076 = vmatprep.subr.mxu0 %v2261_v6 }
 0x64b   : > { %v2210_v17 = vpop.eup %2209 }
 0x64c   : > { %v1015_v18 = vmul.f32 %v2210_v17, %v2204_v5  ;;  %v1363_v21 = vpop.permute.xlu1 %1362  ;;  %v2193_v5 = vld [vmem:[%s2433_s0 + $0x20] sm:$0xff]  }
 0x64e   : > { %2069 = vmatmul.mubr.msk.f32.vlgmr.msra.gmra.mrb[6].mxu0 %vm762_vm4, %v1015_v18 }
 0x64f   : > { %v2212_v19 = vpop.eup %2211  ;;  %2077 = vmatpush3.msra.mxu0 %v1190_v13  ;;  %2078 = vmatprep.mubr.msk.f32.mxu0 %vm2262_vm2, %v2261_v6 }
 0x650   : > { %v1188_v20 = vmul.f32 %v2212_v19, %v2206_v8  ;;  %2086 = vmatprep.subr.mxu0 %v2261_v6  ;;  %v2195_v8 = vld [vmem:[%s2433_s0 + $0x30] sm:$0xff]  }
 0x652   : > { %2079 = vmatmul.mubr.msk.f32.vlgmr.msra.gmra.mrb[8].mxu0 %vm762_vm4, %v1188_v20 }
 0x653   : > { %v2214_v22 = vpop.eup %2213  ;;  %2087 = vmatpush3.msra.mxu0 %v1363_v21  ;;  %2088 = vmatprep.mubr.msk.f32.mxu0 %vm2262_vm2, %v2261_v6 }
 0x654   : > { %v1361_v23 = vmul.f32 %v2214_v22, %v2208_v10  ;;  %2091 = vmatprep.subr.bf16.mxu0 %v2261_v6  ;;  %v1987_v10 = vld [vmem:[%s640_s3] ss:$0 sm:$0xff] }
 0x656   : > { %2089 = vmatmul.mubr.msk.f32.vlgmr.msra.gmra.mrb[10].mxu0 %vm762_vm4, %v1361_v23 }
 0x657   : > { %2095 = vmatprep.mubr.msk.bf16.mxu0 %vm2262_vm2, %v2261_v6  ;;  %2092 = vmatpush3.bf16.msra.mxu0 %v2185_v24 }
 0x658   : > { %2093 = vmatprep.subr.bf16.mxu0 %v2261_v6 }
 0x65b   : > { %2094 = vmatpush3.bf16.msra.mxu0 %v2186_v25 }
 0x65c   : > { %2099 = vmatprep.subr.bf16.mxu0 %v2261_v6 }
 0x721   : > { %v1088_v26 = vpop.f32.mrb[6].mxu0 }
 0x722   : > { %1093 = vrot.lane.b32.xlu1 %v1088_v26, %s2274_s24  ;;  %v2070_v27 = vpop.f32.mrb[7].mxu0  ;;  %v1999_v26 = vld [vmem:[%s648_s19] ss:$0 sm:$0xff]  ;;  %s2664_s24 = sld [smem:[#allocation16_spill]] (!%p2000_p8) }
 0x725   : > { %v1261_v28 = vpop.f32.mrb[8].mxu0 }
 0x726   : > { %1266 = vrot.lane.b32.xlu0 %v1261_v28, %s2275_s15  ;;  %v2080_v29 = vpop.f32.mrb[9].mxu0 }
 0x729   : > { %v1434_v30 = vpop.f32.mrb[10].mxu0 }
 0x72a   : > { %1439 = vrot.lane.b32.xlu1 %v1434_v30, %s2276_s12  ;;  %v2090_v31 = vpop.f32.mrb[11].mxu0 }
 0x794   : > { %v1094_v32 = vpop.permute.xlu1 %1093 }
 0x795   : > { %1097 = vst.msk [vmem:[#allocation4] sm:$0xff] %vm1096_vm5, %v1094_v32 }
 0x798   : > { %v1267_v33 = vpop.permute.xlu0 %1266 }
 0x799   : > { %1270 = vst.msk [vmem:[#allocation4] sm:$0xff] %vm1269_vm6, %v1267_v33 }
 0x79c   : > { %v1440_v34 = vpop.permute.xlu1 %1439 }
 0x79d   : > { %1443 = vst.msk [vmem:[#allocation4] sm:$0xff] %vm1442_vm7, %v1440_v34 }
 0x7a4   : > { %v1444_v35 = vld [vmem:[#allocation4] sm:$0xff] }
 0x7a5   : > { %v1445_v36 = vpack.c.bf16 %v1444_v35, %v1444_v35 }
 0x7a7   : > { %2096 = vmatmul.mubr.msk.bf16.vlgmr.msra.gmra.mrb[12].mxu0 %vm668_vm1, %v1445_v36 }
 0x7a8   : > { %2103 = vmatprep.mubr.msk.bf16.mxu0 %vm2262_vm2, %v2261_v6  ;;  %2100 = vmatpush3.bf16.msra.mxu0 %v2187_v47  ;;  %v2002_v47 = vld [vmem:[%s2664_s24] ss:$0 sm:$0xff] (!%p2000_p8) }
 0x7a9   : > { %2101 = vmatprep.subr.bf16.mxu0 %v2261_v6 }
 0x7ac   : > { %2102 = vmatpush3.bf16.msra.mxu0 %v2188_v48 }
 0x87a   : > { %v1506_v38 = vpop.f32.mrb[12].mxu0 }
 0x87b   : > { %v1507_v39 = vadd.f32 %v1981_v37, %v1506_v38  ;;  %v2097_v40 = vpop.f32.mrb[13].mxu0 }
 0x87c   : > { %v1509_v41 = vpop.f32.mrb[14].mxu0 }
 0x87d   : > { %v2546_v42 = vadd.f32 %v1507_v39, %v2445_v1  ;;  %v2098_v43 = vpop.f32.mrb[15].mxu0  ;;  %v2189_v1 = vld [vmem:[%s2433_s0] sm:$0xff]  }
 0x87e   : > { %2108 = vmatpush3.bf16.msra.mxu1 %v2189_v1 }
 0x87f   : > { %v1515_v44 = vsel %vm668_vm1, %v2546_v42, 0.0  ;;  %v1519_v45 = vmul.f32 %v2546_v42, %v2546_v42  ;;  %2109 = vmatprep.subr.bf16.mxu1 %v2261_v6 }
 0x880   : > { %1516 = vadd.xlane.f32.xlu0 %v1515_v44 }
 0x881   : > { %v1520_v46 = vsel %vm668_vm1, %v1519_v45, 0.0  ;;  %v2001_v45 = vld [vmem:[%s2663_s13] ss:$0 sm:$0xff] (!%p2000_p8) }
 0x882   : > { %1521 = vadd.xlane.f32.xlu1 %v1520_v46  ;;  %2110 = vmatpush3.bf16.msra.mxu1 %v2190_v2 }
 0x883   : > { %2111 = vmatprep.subr.bf16.mxu1 %v2261_v6 }
 0x886   : > { %2112 = vmatpush3.bf16.msra.mxu1 %v2191_v3 }
 0x887   : > { %2113 = vmatprep.subr.bf16.mxu1 %v2261_v6 }
 0x88a   : > { %2114 = vmatpush3.bf16.msra.mxu1 %v2192_v4 }
 0x88b   : > { %2115 = vmatprep.subr.bf16.mxu1 %v2261_v6 }
 0x88e   : > { %2116 = vmatpush3.bf16.msra.mxu1 %v2193_v5 }
 0x88f   : > { %2117 = vmatprep.subr.bf16.mxu1 %v2261_v6 }
 0x892   : > { %2118 = vmatpush3.bf16.msra.mxu1 %v2194_v7 }
 0x893   : > { %2119 = vmatprep.subr.bf16.mxu1 %v2261_v6 }
 0x896   : > { %2120 = vmatpush3.bf16.msra.mxu1 %v2195_v8 }
 0x897   : > { %2121 = vmatprep.subr.bf16.mxu1 %v2261_v6 }
 0x89a   : > { %2122 = vmatpush3.bf16.msra.mxu1 %v2196_v9 }
 0x90d   : > { %v1517_v49 = vpop.xlane.xlu0 %1516 }
 0x90e   : > { %v1518_v50 = vmul.f32 0.03125, %v1517_v49 }
 0x90f   : > { %v1522_v51 = vpop.xlane.xlu1 %1521 }
 0x910   : > { %v1524_v52 = vmul.f32 %v1518_v50, %v1518_v50  ;;  %v1523_v53 = vmul.f32 0.03125, %v1522_v51  ;;  %v1527_v57 = vsub.f32 %v2546_v42, %v1518_v50 }
 0x912   : > { %v1525_v54 = vsub.f32 %v1523_v53, %v1524_v52 }
 0x914   : > { %v1526_v55 = vmax.f32 %v1525_v54, 0.0 }
 0x916   : > { %v1528_v56 = vadd.f32 1e-05, %v1526_v55 }
 0x918   : > { %2215 = vrsqrt.f32 %v1528_v56 }
 0x922   : > { %v2216_v58 = vpop.eup %2215 }
 0x923   : > { %v1530_v60 = vmul.f32 %v2216_v58, %v1527_v57 }
 0x925   : > { %v1537_v62 = vmul.f32 %v1985_v59, %v1530_v60 }
 0x927   : > { %v1544_v63 = vadd.f32 %v1986_v61, %v1537_v62 }
 0x929   : > { %v1545_v0 = vpack.c.bf16 %v1544_v63, %v1544_v63 }
 0x92b   : > { %2104 = vmatmul.mubr.msk.bf16.vlgmr.msra.gmra.mrb[16].mxu0 %vm668_vm1, %v1545_v0 }
 0x9fe   : > { %v1606_v11 = vpop.f32.mrb[16].mxu0 }
 0x9ff   : > { %v1607_v12 = vadd.f32 %v1987_v10, %v1606_v11  ;;  %v2105_v13 = vpop.f32.mrb[17].mxu0 }
 0xa00   : > { %v1609_v14 = vpop.f32.mrb[18].mxu0 }
 0xa01   : > { %v1613_v15 = vmul.f32 0.044715, %v1607_v12  ;;  %v2106_v16 = vpop.f32.mrb[19].mxu0  ;;  %v1612_v6 = vmul.f32 0.5, %v1607_v12 }
 0xa03   : > { %v1614_v17 = vmul.f32 %v1613_v15, %v1607_v12 }
 0xa05   : > { %v1615_v18 = vmul.f32 %v1614_v17, %v1607_v12 }
 0xa07   : > { %v1616_v19 = vadd.f32 %v1615_v18, %v1607_v12 }
 0xa09   : > { %v1617_v20 = vmul.f32 0.7978846, %v1616_v19 }
 0xa0b   : > { %2217 = vtanh.f32 %v1617_v20 }
 0xa15   : > { %v2218_v21 = vpop.eup %2217 }
 0xa16   : > { %v1619_v22 = vadd.f32 1.0, %v2218_v21 }
 0xa18   : > { %v1620_v23 = vmul.f32 %v1619_v22, %v1612_v6 }
 0xa1a   : > { %v1621_v24 = vpack.c.bf16 %v1620_v23, %v1620_v23 }
 0xa1c   : > { %2124 = vmatmul.mubr.bf16.vlgmr.msra.gmra.mrb[8].mxu1 %v1621_v24 }
 0xaee   : > { %1739 = sbr.rel (%p2000_p8) target bundleno = 2977 (0xba1), region = 84 }
 0xaef   : > { %v1720_v25 = vpop.f32.mrb[8].mxu1 }
 0xaf0   : > { %v1726_v27 = vadd.f32 %v1720_v25, %v2546_v42  ;;  %v2125_v28 = vpop.f32.mrb[9].mxu1 }
 0xaf1   : > { %v1723_v29 = vpop.f32.mrb[10].mxu1 }
 0xaf2   : > { %v1734_v30 = vadd.f32 %v1999_v26, %v1726_v27  ;;  %v2126_v31 = vpop.f32.mrb[11].mxu1 }
 0xaf4   : > { %1735 = vst.msk [vmem:[#allocation2] sm:$0xff] %vm668_vm1, %v1734_v30  ;;  %v1742_v32 = vsel (!%p2000_p8), %vm668_vm1, %v1734_v30, 0.0  ;;  %v1746_v33 = vmul.f32 (!%p2000_p8), %v1734_v30, %v1734_v30 }
 0xaf5   : > { %1743 = vadd.xlane.f32.xlu0 %v1742_v32 }
 0xaf6   : > { %v1747_v34 = vsel %vm668_vm1, %v1746_v33, 0.0 }
 0xaf9   : > { %1748 = vadd.xlane.f32.xlu0 %v1747_v34 }
 0xb82   : > { %v1744_v35 = vpop.xlane.xlu0 %1743 }
 0xb83   : > { %v1745_v36 = vmul.f32 0.03125, %v1744_v35 }
 0xb85   : > { %v1751_v38 = vmul.f32 %v1745_v36, %v1745_v36  ;;  %v1754_v43 = vsub.f32 %v1734_v30, %v1745_v36 }
 0xb86   : > { %v1749_v37 = vpop.xlane.xlu0 %1748 }
 0xb87   : > { %v1750_v39 = vmul.f32 0.03125, %v1749_v37 }
 0xb89   : > { %v1752_v40 = vsub.f32 %v1750_v39, %v1751_v38 }
 0xb8b   : > { %v1753_v41 = vmax.f32 %v1752_v40, 0.0 }
 0xb8d   : > { %v1755_v42 = vadd.f32 1e-05, %v1753_v41 }
 0xb8f   : > { %2219 = vrsqrt.f32 %v1755_v42 }
 0xb99   : > { %v2220_v44 = vpop.eup %2219 }
 0xb9a   : > { %v1757_v46 = vmul.f32 %v2220_v44, %v1754_v43 }
 0xb9c   : > { %v1764_v48 = vmul.f32 %v2001_v45, %v1757_v46 }
 0xb9e   : > { %v1771_v1 = vadd.f32 %v2002_v47, %v1764_v48 }
 0xba0   : > { %1772 = vst.msk [vmem:[%s2442_s2] sm:$0xff] %vm668_vm1, %v1771_v1 }
 0xba1 PF: > { %s2665_s15 = sld [smem:[#allocation8_spill]]  ;;  %s2666_s29 = sld [smem:[#allocation6_spill]] }
 0xba2   : > { %s2667_s30 = sld [smem:[#allocation7_spill]]  ;;  %s2669_s16 = sld [smem:[#allocation10_spill]] }
 0xba7   : > { %s24_s17 = sadd.s32 1, %s2665_s15   ;;  %s2668_s15 = sld [smem:[#allocation9_spill]] }
 0xba8   : > { %p21_p9 = scmp.ge.s32.totalorder %s24_s17, 6  }
 0xbaa   :  { %23 = sbr.rel (!%p21_p9) target bundleno = 7 (0x7), region = 147 }

</bundles_post_ra>
